<compile_context>
chip_gen: v5e
topology: v5e:2x2
jax: 0.10.0
libtpu: 0.0.40
codegen_flags: <defaults>
</compile_context>

<pallas_src>
import functools

import jax
import jax.numpy as jnp
from jax import lax
from jax.experimental import pallas as pl
from jax.experimental.pallas import tpu as pltpu


# ----------------------------------------------------------------------------
# Fused kernel: per (batch, query-tile)
#   qi==0 : [Q|K|V] = x @ Wqkv  (one wide MXU matmul) -> VMEM scratch
#   all qi: per head, online-softmax over key blocks 0..qi (causal skip),
#           diagonal block masked with an additive -1e30 bias
#   epilogue: y = att @ Wp + bp  (fused projection, lane-dense (tq,C) store)
# ----------------------------------------------------------------------------
def _mha_fused_kernel(xf_ref, wqkv_ref, wp_ref, bp_ref, o_ref,
                      q_sc, k_sc, v_sc, att_sc,
                      *, num_heads, head_size, q_tile, approx_recip):
    qi = pl.program_id(1)
    hs = head_size
    hhs = num_heads * head_size

    # ---- Fused QKV projection for the whole sequence, once per batch elem.
    #      (1/sqrt(hs) already folded into the Q columns of wqkv.) ----
    @pl.when(qi == 0)
    def _():
        xf = xf_ref[0].astype(jnp.bfloat16)                          # (T, C)
        qkv = jnp.dot(xf, wqkv_ref[...],
                      preferred_element_type=jnp.float32)            # (T, 3*hhs)
        q_sc[...] = qkv[:, :hhs].astype(jnp.bfloat16)
        k_sc[...] = qkv[:, hhs:2 * hhs].astype(jnp.bfloat16)
        v_sc[...] = qkv[:, 2 * hhs:].astype(jnp.bfloat16)

    q_start = pl.multiple_of(qi * q_tile, q_tile)

    # Additive causal bias for the diagonal key block only (finite -1e30 so a
    # fully-shifted row can never produce exp(-inf - -inf) NaNs). Off-diagonal
    # key blocks kb < qi are never masked and are handled without any bias.
    row = lax.broadcasted_iota(jnp.int32, (q_tile, q_tile), 0)
    col = lax.broadcasted_iota(jnp.int32, (q_tile, q_tile), 1)
    diag_bias = jnp.where(col <= row, 0.0, -1e30).astype(jnp.float32)

    for h in range(num_heads):                                       # static unroll
        sl = slice(h * hs, (h + 1) * hs)
        q_h = q_sc[pl.ds(q_start, q_tile), sl]                       # (tq, hs) bf16

        def kv_block(k_start, bias, m_i, l_i, acc):
            k_b = k_sc[pl.ds(k_start, q_tile), sl]                   # (tk, hs) bf16
            v_b = v_sc[pl.ds(k_start, q_tile), sl]                   # (tk, hs) bf16
            # Q_h K_h^T without an explicit transpose: contract last dims.
            s = lax.dot_general(q_h, k_b,
                                dimension_numbers=(((1,), (1,)), ((), ())),
                                preferred_element_type=jnp.float32)  # (tq, tk)
            if bias is not None:
                s = s + bias
            m_new = jnp.maximum(m_i, jnp.max(s, axis=-1, keepdims=True))
            alpha = jnp.exp(m_i - m_new)
            p = jnp.exp(s - m_new)
            l_new = alpha * l_i + jnp.sum(p, axis=-1, keepdims=True)
            acc_new = alpha * acc + jnp.dot(p.astype(jnp.bfloat16), v_b,
                                            preferred_element_type=jnp.float32)
            return m_new, l_new, acc_new

        def body(kb, carry):
            m_i, l_i, acc = carry
            return kv_block(pl.multiple_of(kb * q_tile, q_tile), None,
                            m_i, l_i, acc)

        init = (jnp.full((q_tile, 1), -jnp.inf, jnp.float32),        # running max
                jnp.zeros((q_tile, 1), jnp.float32),                 # running sum
                jnp.zeros((q_tile, hs), jnp.float32))                # output acc
        # Fully-unmasked key blocks 0 .. qi-1 (skipped entirely for qi == 0).
        m_i, l_i, acc = lax.fori_loop(0, qi, body, init)
        # Diagonal key block with the causal bias.
        m_i, l_i, acc = kv_block(q_start, diag_bias, m_i, l_i, acc)

        inv_l = pl.reciprocal(l_i, approx=approx_recip)              # EUP slot
        # dropout(p) -> identity in eval mode
        att_sc[:, sl] = (acc * inv_l).astype(jnp.bfloat16)

    # ---- Fused output projection epilogue: lane-dense (tq, C) store. ----
    y = jnp.dot(att_sc[...], wp_ref[...], preferred_element_type=jnp.float32)
    y = y + bp_ref[...]
    # dropout(y) -> identity in eval mode
    o_ref[0] = y.astype(o_ref.dtype)


# ----------------------------------------------------------------------------
# Wrapper
# ----------------------------------------------------------------------------
def _vmem_limit_bytes(B, T, C, hhs, q_tile):
    bf16, f32 = 2, 4
    scratch = 3 * T * hhs * bf16 + q_tile * hhs * bf16
    blocks = (2 * T * C * f32            # full-sequence x block (double-buffered)
              + 2 * C * 3 * hhs * bf16   # wqkv
              + 2 * hhs * C * bf16       # w_proj
              + 2 * C * f32              # b_proj
              + 2 * q_tile * C * f32)    # output block
    total = scratch + blocks
    # Generous headroom for compiler-internal scratch / layout padding.
    return int(min(max(2 * total + (8 << 20), 16 << 20), 64 << 20))


def prepare_params(params, *, num_heads, head_size):
    """One-time weight preparation.

    Cache the result outside any hot loop: fuses Wq/Wk/Wv into one
    (C, 3*H*hs) bf16 matrix with the 1/sqrt(hs) attention scale folded into
    the Q columns, and casts the projection weights once (no per-call
    convert kernels / weight re-writes to HBM).
    """
    scale = float(head_size) ** -0.5
    wqkv = jnp.concatenate(
        [params["wq"] * scale, params["wk"], params["wv"]], axis=1
    ).astype(jnp.bfloat16)
    return {
        "wqkv": wqkv,
        "w_proj": params["w_proj"].astype(jnp.bfloat16),
        "b_proj": params["b_proj"].astype(jnp.float32),
    }


@functools.partial(
    jax.jit,
    static_argnames=("num_heads", "head_size", "q_tile", "approx_recip"))
def multi_head_attention(x, prepared, *, num_heads, head_size, q_tile=None,
                         approx_recip=True):
    """x: (B, T, C) f32 -> (B, T, C) f32 (eval-mode MultiHeadAttention)."""
    B, T, C = x.shape
    hhs = num_heads * head_size
    wqkv, wp, bp = prepared["wqkv"], prepared["w_proj"], prepared["b_proj"]
    assert wqkv.shape == (C, 3 * hhs), wqkv.shape

    if q_tile is None:
        # Sweep per generation; 64 keeps vreg pressure low at T=256, and
        # q_tile == T removes the multi-tile machinery for short sequences.
        q_tile = T if T <= 64 else 64
    assert T % q_tile == 0 and q_tile % 8 == 0, (T, q_tile)
    n_q = T // q_tile

    kernel = functools.partial(_mha_fused_kernel, num_heads=num_heads,
                               head_size=head_size, q_tile=q_tile,
                               approx_recip=approx_recip)

    # Advisory cost estimate (causal => ~half the T*T attention work).
    flops = (2 * B * T * C * 3 * hhs                       # fused QKV projection
             + 2 * B * num_heads * T * T * head_size       # QK^T + PV, causal
             + 2 * B * T * hhs * C)                        # output projection
    transcendentals = B * num_heads * T * T // 2
    bytes_accessed = (B * T * C * 4                        # x read
                      + C * 3 * hhs * 2 + hhs * C * 2 + C * 4   # weights
                      + B * T * C * 4)                     # output write

    return pl.pallas_call(
        kernel,
        out_shape=jax.ShapeDtypeStruct((B, T, C), x.dtype),
        grid_spec=pltpu.PrefetchScalarGridSpec(
            num_scalar_prefetch=0,
            grid=(B, n_q),
            in_specs=[
                # full sequence for this batch element; block index constant
                # across i -> no re-DMA across query tiles
                pl.BlockSpec((1, T, C), lambda b, i: (b, 0, 0)),
                pl.BlockSpec((C, 3 * hhs), lambda b, i: (0, 0)),
                pl.BlockSpec((hhs, C), lambda b, i: (0, 0)),
                pl.BlockSpec((1, C), lambda b, i: (0, 0)),
            ],
            out_specs=pl.BlockSpec((1, q_tile, C), lambda b, i: (b, i, 0)),
            scratch_shapes=[
                pltpu.VMEM((T, hhs), jnp.bfloat16),       # Q (pre-scaled)
                pltpu.VMEM((T, hhs), jnp.bfloat16),       # K
                pltpu.VMEM((T, hhs), jnp.bfloat16),       # V
                pltpu.VMEM((q_tile, hhs), jnp.bfloat16),  # per-tile head outputs
            ],
        ),
        compiler_params=pltpu.CompilerParams(
            dimension_semantics=("parallel", "arbitrary"),
            vmem_limit_bytes=_vmem_limit_bytes(B, T, C, hhs, q_tile),
        ),
        cost_estimate=pl.CostEstimate(flops=flops,
                                      transcendentals=transcendentals,
                                      bytes_accessed=bytes_accessed),
    )(x, wqkv, wp, bp)


# ----------------------------------------------------------------------------
# Pure-JAX reference (f32) and parameter init
# ----------------------------------------------------------------------------
def mha_reference(x, params, num_heads, head_size):
    B, T, C = x.shape
    q = (x @ params["wq"]).reshape(B, T, num_heads, head_size)
    k = (x @ params["wk"]).reshape(B, T, num_heads, head_size)
    v = (x @ params["wv"]).reshape(B, T, num_heads, head_size)
    s = jnp.einsum("bqhd,bkhd->bhqk", q, k) * head_size ** -0.5
    mask = jnp.tril(jnp.ones((T, T), dtype=bool))
    s = jnp.where(mask[None, None], s, -jnp.inf)
    p = jax.nn.softmax(s, axis=-1)
    o = jnp.einsum("bhqk,bkhd->bqhd", p, v).reshape(B, T, num_heads * head_size)
    return o @ params["w_proj"] + params["b_proj"]


def init_params(key, n_embd, num_heads, head_size):
    kq, kk, kv, kp, kb = jax.random.split(key, 5)
    s_in = (1.0 / n_embd) ** 0.5
    s_cat = (1.0 / (num_heads * head_size)) ** 0.5
    hhs = num_heads * head_size
    return {
        "wq": jax.random.uniform(kq, (n_embd, hhs), jnp.float32, -s_in, s_in),
        "wk": jax.random.uniform(kk, (n_embd, hhs), jnp.float32, -s_in, s_in),
        "wv": jax.random.uniform(kv, (n_embd, hhs), jnp.float32, -s_in, s_in),
        "w_proj": jax.random.uniform(kp, (hhs, n_embd), jnp.float32, -s_cat, s_cat),
        "b_proj": jax.random.uniform(kb, (1, n_embd), jnp.float32, -s_cat, s_cat),
    }


if __name__ == "__main__":
    # Small shapes consistent with the module (B, T, n_embd), H heads of head_size.
    B, T = 2, 16
    n_embd_s, num_heads, head_size = 64, 4, 16

    key = jax.random.PRNGKey(0)
    kx, kp = jax.random.split(key)
    x = jax.random.normal(kx, (B, T, n_embd_s), dtype=jnp.float32)
    params = init_params(kp, n_embd_s, num_heads, head_size)
    prepared = prepare_params(params, num_heads=num_heads, head_size=head_size)

    # q_tile=8 -> two query tiles per batch element: exercises the qi==0
    # fused-QKV scratch path, the off-diagonal (unmasked) key-block fori_loop
    # and the masked diagonal block.
    out = multi_head_attention(x, prepared, num_heads=num_heads,
                               head_size=head_size, q_tile=8)
    out = jax.block_until_ready(out)

    assert out.shape == (B, T, n_embd_s), out.shape
    assert bool(jnp.all(jnp.isfinite(out)))

    ref = mha_reference(x, params, num_heads, head_size)
    max_err = float(jnp.max(jnp.abs(out - ref)))
    assert max_err < 5e-2, max_err   # bf16 matmuls vs f32 reference

    print("KERNEL_OK")
</pallas_src>

<mosaic_0001>
module attributes {stable_mosaic.version = 11 : i64} {
  func.func @_mha_fused_kernel(%arg0: i32, %arg1: i32, %arg2: memref<1x16x64xf32, #tpu.memory_space<vmem>>, %arg3: memref<64x192xbf16, #tpu.memory_space<vmem>>, %arg4: memref<64x64xbf16, #tpu.memory_space<vmem>>, %arg5: memref<1x64xf32, #tpu.memory_space<vmem>>, %arg6: memref<1x8x64xf32, #tpu.memory_space<vmem>>, %arg7: memref<16x64xbf16, #tpu.memory_space<vmem>>, %arg8: memref<16x64xbf16, #tpu.memory_space<vmem>>, %arg9: memref<16x64xbf16, #tpu.memory_space<vmem>>, %arg10: memref<8x64xbf16, #tpu.memory_space<vmem>>) attributes {dimension_semantics = [#tpu.dimension_semantics<parallel>, #tpu.dimension_semantics<arbitrary>], iteration_bounds = array<i64: 2, 2>, scalar_prefetch = 0 : i64, scratch_operands = 4 : i64, tpu.core_type = #tpu.core_type<tc>, window_params = [{transform_indices = @transform_0, window_bounds = array<i64: 1, 16, 64>}, {pipeline_mode = #tpu.pipeline_mode<synchronous>, transform_indices = @transform_1, window_bounds = array<i64: 64, 192>}, {pipeline_mode = #tpu.pipeline_mode<synchronous>, transform_indices = @transform_2, window_bounds = array<i64: 64, 64>}, {pipeline_mode = #tpu.pipeline_mode<synchronous>, transform_indices = @transform_3, window_bounds = array<i64: 1, 64>}, {transform_indices = @transform_4, window_bounds = array<i64: 1, 8, 64>}]} {
    %c0_i32 = arith.constant 0 : i32
    %0 = arith.cmpi eq, %arg1, %c0_i32 : i32
    %1 = arith.extui %0 : i1 to i32
    %c0_i32_0 = arith.constant 0 : i32
    %2 = arith.cmpi ne, %1, %c0_i32_0 : i32
    scf.if %2 {
      %c0_63 = arith.constant 0 : index
      %c0_64 = arith.constant 0 : index
      %c0_65 = arith.constant 0 : index
      %164 = vector.load %arg2[%c0_63, %c0_64, %c0_65] : memref<1x16x64xf32, #tpu.memory_space<vmem>>, vector<1x16x64xf32>
      %165 = vector.shape_cast %164 : vector<1x16x64xf32> to vector<16x64xf32>
      %166 = arith.truncf %165 : vector<16x64xf32> to vector<16x64xbf16>
      %c0_66 = arith.constant 0 : index
      %c0_67 = arith.constant 0 : index
      %167 = vector.load %arg3[%c0_66, %c0_67] : memref<64x192xbf16, #tpu.memory_space<vmem>>, vector<64x192xbf16>
      %cst_68 = arith.constant dense<0.000000e+00> : vector<16x192xf32>
      %168 = tpu.matmul %166, %167, %cst_68 {dimension_numbers = #tpu.dot_dimension_numbers<[1], [0], [0], [1], [0, 0, 1, 1], [], []>} : vector<16x64xbf16>, vector<64x192xbf16>, vector<16x192xf32> -> vector<16x192xf32>
      %169 = vector.extract_strided_slice %168 {offsets = [0, 0], sizes = [16, 64], strides = [1, 1]} : vector<16x192xf32> to vector<16x64xf32>
      %170 = arith.truncf %169 : vector<16x64xf32> to vector<16x64xbf16>
      %c0_69 = arith.constant 0 : index
      %c0_70 = arith.constant 0 : index
      %171 = vector.load %arg7[%c0_69, %c0_70] : memref<16x64xbf16, #tpu.memory_space<vmem>>, vector<16x64xbf16>
      tpu.vector_store %arg7[%c0_69, %c0_70], %170 {strides = array<i32>} : memref<16x64xbf16, #tpu.memory_space<vmem>>, vector<16x64xbf16>,
      %172 = vector.extract_strided_slice %168 {offsets = [0, 64], sizes = [16, 64], strides = [1, 1]} : vector<16x192xf32> to vector<16x64xf32>
      %173 = arith.truncf %172 : vector<16x64xf32> to vector<16x64xbf16>
      %c0_71 = arith.constant 0 : index
      %c0_72 = arith.constant 0 : index
      %174 = vector.load %arg8[%c0_71, %c0_72] : memref<16x64xbf16, #tpu.memory_space<vmem>>, vector<16x64xbf16>
      tpu.vector_store %arg8[%c0_71, %c0_72], %173 {strides = array<i32>} : memref<16x64xbf16, #tpu.memory_space<vmem>>, vector<16x64xbf16>,
      %175 = vector.extract_strided_slice %168 {offsets = [0, 128], sizes = [16, 64], strides = [1, 1]} : vector<16x192xf32> to vector<16x64xf32>
      %176 = arith.truncf %175 : vector<16x64xf32> to vector<16x64xbf16>
      %c0_73 = arith.constant 0 : index
      %c0_74 = arith.constant 0 : index
      %177 = vector.load %arg9[%c0_73, %c0_74] : memref<16x64xbf16, #tpu.memory_space<vmem>>, vector<16x64xbf16>
      tpu.vector_store %arg9[%c0_73, %c0_74], %176 {strides = array<i32>} : memref<16x64xbf16, #tpu.memory_space<vmem>>, vector<16x64xbf16>,
    } else {
    }
    %c8_i32 = arith.constant 8 : i32
    %3 = arith.muli %arg1, %c8_i32 : i32
    %4 = tpu.assume_multiple %3, 8 : i32
    %5 = tpu.iota {dimensions = array<i32: 0>} : vector<8x8xi32>
    %6 = tpu.iota {dimensions = array<i32: 1>} : vector<8x8xi32>
    %7 = arith.cmpi sle, %6, %5 : vector<8x8xi32>
    %cst = arith.constant 0.000000e+00 : f32
    %cst_1 = arith.constant -1.000000e+30 : f32
    %8 = vector.broadcast %cst : f32 to vector<8x8xf32>
    %9 = vector.broadcast %cst_1 : f32 to vector<8x8xf32>
    %10 = arith.select %7, %8, %9 : vector<8x8xi1>, vector<8x8xf32>
    %11 = arith.index_cast %4 : i32 to index
    %c0 = arith.constant 0 : index
    %12 = vector.load %arg7[%11, %c0] : memref<16x64xbf16, #tpu.memory_space<vmem>>, vector<8x16xbf16>
    %cst_2 = arith.constant 0xFF800000 : f32
    %13 = vector.broadcast %cst_2 : f32 to vector<8x1xf32>
    %cst_3 = arith.constant 0.000000e+00 : f32
    %14 = vector.broadcast %cst_3 : f32 to vector<8x1xf32>
    %cst_4 = arith.constant 0.000000e+00 : f32
    %15 = vector.broadcast %cst_4 : f32 to vector<8x16xf32>
    %c0_i32_5 = arith.constant 0 : i32
    %16 = arith.subi %arg1, %c0_i32_5 : i32
    %17 = arith.addi %c0_i32_5, %16 : i32
    %c1_i32 = arith.constant 1 : i32
    %18:3 = scf.for %arg11 = %c0_i32_5 to %17 step %c1_i32 iter_args(%arg12 = %13, %arg13 = %14, %arg14 = %15) -> (vector<8x1xf32>, vector<8x1xf32>, vector<8x16xf32>)  : i32 {
      %c8_i32_63 = arith.constant 8 : i32
      %164 = arith.muli %arg11, %c8_i32_63 : i32
      %165 = tpu.assume_multiple %164, 8 : i32
      %166 = arith.index_cast %165 : i32 to index
      %c0_64 = arith.constant 0 : index
      %167 = vector.load %arg8[%166, %c0_64] : memref<16x64xbf16, #tpu.memory_space<vmem>>, vector<8x16xbf16>
      %168 = arith.index_cast %165 : i32 to index
      %c0_65 = arith.constant 0 : index
      %169 = vector.load %arg9[%168, %c0_65] : memref<16x64xbf16, #tpu.memory_space<vmem>>, vector<8x16xbf16>
      %cst_66 = arith.constant dense<0.000000e+00> : vector<8x8xf32>
      %170 = tpu.matmul %12, %167, %cst_66 {dimension_numbers = #tpu.dot_dimension_numbers<[1], [1], [0], [0], [0, 0, 1, 0], [], []>} : vector<8x16xbf16>, vector<8x16xbf16>, vector<8x8xf32> -> vector<8x8xf32>
      %cst_67 = arith.constant dense<0xFF800000> : vector<8xf32>
      %171 = vector.multi_reduction <maximumf>, %170, %cst_67 [1] : vector<8x8xf32> to vector<8xf32>
      %172 = vector.shape_cast %171 : vector<8xf32> to vector<8x1xf32>
      %173 = arith.maximumf %arg12, %172 : vector<8x1xf32>
      %174 = arith.subf %arg12, %173 : vector<8x1xf32>
      %175 = math.exp %174 : vector<8x1xf32>
      %176 = vector.broadcast %173 : vector<8x1xf32> to vector<8x8xf32>
      %177 = arith.subf %170, %176 : vector<8x8xf32>
      %178 = math.exp %177 : vector<8x8xf32>
      %179 = arith.mulf %175, %arg13 : vector<8x1xf32>
      %cst_68 = arith.constant dense<0.000000e+00> : vector<8xf32>
      %180 = vector.multi_reduction <add>, %178, %cst_68 [1] : vector<8x8xf32> to vector<8xf32>
      %181 = vector.shape_cast %180 : vector<8xf32> to vector<8x1xf32>
      %182 = arith.addf %179, %181 : vector<8x1xf32>
      %183 = vector.broadcast %175 : vector<8x1xf32> to vector<8x16xf32>
      %184 = arith.mulf %183, %arg14 : vector<8x16xf32>
      %185 = arith.truncf %178 : vector<8x8xf32> to vector<8x8xbf16>
      %cst_69 = arith.constant dense<0.000000e+00> : vector<8x16xf32>
      %186 = tpu.matmul %185, %169, %cst_69 {dimension_numbers = #tpu.dot_dimension_numbers<[1], [0], [0], [1], [0, 0, 1, 1], [], []>} : vector<8x8xbf16>, vector<8x16xbf16>, vector<8x16xf32> -> vector<8x16xf32>
      %187 = arith.addf %184, %186 : vector<8x16xf32>
      scf.yield %173, %182, %187 : vector<8x1xf32>, vector<8x1xf32>, vector<8x16xf32>
    }
    %19 = arith.index_cast %4 : i32 to index
    %c0_6 = arith.constant 0 : index
    %20 = vector.load %arg8[%19, %c0_6] : memref<16x64xbf16, #tpu.memory_space<vmem>>, vector<8x16xbf16>
    %21 = arith.index_cast %4 : i32 to index
    %c0_7 = arith.constant 0 : index
    %22 = vector.load %arg9[%21, %c0_7] : memref<16x64xbf16, #tpu.memory_space<vmem>>, vector<8x16xbf16>
    %cst_8 = arith.constant dense<0.000000e+00> : vector<8x8xf32>
    %23 = tpu.matmul %12, %20, %cst_8 {dimension_numbers = #tpu.dot_dimension_numbers<[1], [1], [0], [0], [0, 0, 1, 0], [], []>} : vector<8x16xbf16>, vector<8x16xbf16>, vector<8x8xf32> -> vector<8x8xf32>
    %24 = arith.addf %23, %10 : vector<8x8xf32>
    %cst_9 = arith.constant dense<0xFF800000> : vector<8xf32>
    %25 = vector.multi_reduction <maximumf>, %24, %cst_9 [1] : vector<8x8xf32> to vector<8xf32>
    %26 = vector.shape_cast %25 : vector<8xf32> to vector<8x1xf32>
    %27 = arith.maximumf %18#0, %26 : vector<8x1xf32>
    %28 = arith.subf %18#0, %27 : vector<8x1xf32>
    %29 = math.exp %28 : vector<8x1xf32>
    %30 = vector.broadcast %27 : vector<8x1xf32> to vector<8x8xf32>
    %31 = arith.subf %24, %30 : vector<8x8xf32>
    %32 = math.exp %31 : vector<8x8xf32>
    %33 = arith.mulf %29, %18#1 : vector<8x1xf32>
    %cst_10 = arith.constant dense<0.000000e+00> : vector<8xf32>
    %34 = vector.multi_reduction <add>, %32, %cst_10 [1] : vector<8x8xf32> to vector<8xf32>
    %35 = vector.shape_cast %34 : vector<8xf32> to vector<8x1xf32>
    %36 = arith.addf %33, %35 : vector<8x1xf32>
    %37 = vector.broadcast %29 : vector<8x1xf32> to vector<8x16xf32>
    %38 = arith.mulf %37, %18#2 : vector<8x16xf32>
    %39 = arith.truncf %32 : vector<8x8xf32> to vector<8x8xbf16>
    %cst_11 = arith.constant dense<0.000000e+00> : vector<8x16xf32>
    %40 = tpu.matmul %39, %22, %cst_11 {dimension_numbers = #tpu.dot_dimension_numbers<[1], [0], [0], [1], [0, 0, 1, 1], [], []>} : vector<8x8xbf16>, vector<8x16xbf16>, vector<8x16xf32> -> vector<8x16xf32>
    %41 = arith.addf %38, %40 : vector<8x16xf32>
    %42 = tpu.reciprocal %36 {approx = true} : vector<8x1xf32> -> vector<8x1xf32>
    %43 = vector.broadcast %42 : vector<8x1xf32> to vector<8x16xf32>
    %44 = arith.mulf %41, %43 : vector<8x16xf32>
    %45 = arith.truncf %44 : vector<8x16xf32> to vector<8x16xbf16>
    %c0_12 = arith.constant 0 : index
    %c0_13 = arith.constant 0 : index
    %46 = vector.load %arg10[%c0_12, %c0_13] : memref<8x64xbf16, #tpu.memory_space<vmem>>, vector<8x16xbf16>
    tpu.vector_store %arg10[%c0_12, %c0_13], %45 {strides = array<i32>} : memref<8x64xbf16, #tpu.memory_space<vmem>>, vector<8x16xbf16>,
    %47 = arith.index_cast %4 : i32 to index
    %c16 = arith.constant 16 : index
    %48 = vector.load %arg7[%47, %c16] : memref<16x64xbf16, #tpu.memory_space<vmem>>, vector<8x16xbf16>
    %cst_14 = arith.constant 0xFF800000 : f32
    %49 = vector.broadcast %cst_14 : f32 to vector<8x1xf32>
    %cst_15 = arith.constant 0.000000e+00 : f32
    %50 = vector.broadcast %cst_15 : f32 to vector<8x1xf32>
    %cst_16 = arith.constant 0.000000e+00 : f32
    %51 = vector.broadcast %cst_16 : f32 to vector<8x16xf32>
    %c0_i32_17 = arith.constant 0 : i32
    %52 = arith.subi %arg1, %c0_i32_17 : i32
    %53 = arith.addi %c0_i32_17, %52 : i32
    %c1_i32_18 = arith.constant 1 : i32
    %54:3 = scf.for %arg11 = %c0_i32_17 to %53 step %c1_i32_18 iter_args(%arg12 = %49, %arg13 = %50, %arg14 = %51) -> (vector<8x1xf32>, vector<8x1xf32>, vector<8x16xf32>)  : i32 {
      %c8_i32_63 = arith.constant 8 : i32
      %164 = arith.muli %arg11, %c8_i32_63 : i32
      %165 = tpu.assume_multiple %164, 8 : i32
      %166 = arith.index_cast %165 : i32 to index
      %c16_64 = arith.constant 16 : index
      %167 = vector.load %arg8[%166, %c16_64] : memref<16x64xbf16, #tpu.memory_space<vmem>>, vector<8x16xbf16>
      %168 = arith.index_cast %165 : i32 to index
      %c16_65 = arith.constant 16 : index
      %169 = vector.load %arg9[%168, %c16_65] : memref<16x64xbf16, #tpu.memory_space<vmem>>, vector<8x16xbf16>
      %cst_66 = arith.constant dense<0.000000e+00> : vector<8x8xf32>
      %170 = tpu.matmul %48, %167, %cst_66 {dimension_numbers = #tpu.dot_dimension_numbers<[1], [1], [0], [0], [0, 0, 1, 0], [], []>} : vector<8x16xbf16>, vector<8x16xbf16>, vector<8x8xf32> -> vector<8x8xf32>
      %cst_67 = arith.constant dense<0xFF800000> : vector<8xf32>
      %171 = vector.multi_reduction <maximumf>, %170, %cst_67 [1] : vector<8x8xf32> to vector<8xf32>
      %172 = vector.shape_cast %171 : vector<8xf32> to vector<8x1xf32>
      %173 = arith.maximumf %arg12, %172 : vector<8x1xf32>
      %174 = arith.subf %arg12, %173 : vector<8x1xf32>
      %175 = math.exp %174 : vector<8x1xf32>
      %176 = vector.broadcast %173 : vector<8x1xf32> to vector<8x8xf32>
      %177 = arith.subf %170, %176 : vector<8x8xf32>
      %178 = math.exp %177 : vector<8x8xf32>
      %179 = arith.mulf %175, %arg13 : vector<8x1xf32>
      %cst_68 = arith.constant dense<0.000000e+00> : vector<8xf32>
      %180 = vector.multi_reduction <add>, %178, %cst_68 [1] : vector<8x8xf32> to vector<8xf32>
      %181 = vector.shape_cast %180 : vector<8xf32> to vector<8x1xf32>
      %182 = arith.addf %179, %181 : vector<8x1xf32>
      %183 = vector.broadcast %175 : vector<8x1xf32> to vector<8x16xf32>
      %184 = arith.mulf %183, %arg14 : vector<8x16xf32>
      %185 = arith.truncf %178 : vector<8x8xf32> to vector<8x8xbf16>
      %cst_69 = arith.constant dense<0.000000e+00> : vector<8x16xf32>
      %186 = tpu.matmul %185, %169, %cst_69 {dimension_numbers = #tpu.dot_dimension_numbers<[1], [0], [0], [1], [0, 0, 1, 1], [], []>} : vector<8x8xbf16>, vector<8x16xbf16>, vector<8x16xf32> -> vector<8x16xf32>
      %187 = arith.addf %184, %186 : vector<8x16xf32>
      scf.yield %173, %182, %187 : vector<8x1xf32>, vector<8x1xf32>, vector<8x16xf32>
    }
    %55 = arith.index_cast %4 : i32 to index
    %c16_19 = arith.constant 16 : index
    %56 = vector.load %arg8[%55, %c16_19] : memref<16x64xbf16, #tpu.memory_space<vmem>>, vector<8x16xbf16>
    %57 = arith.index_cast %4 : i32 to index
    %c16_20 = arith.constant 16 : index
    %58 = vector.load %arg9[%57, %c16_20] : memref<16x64xbf16, #tpu.memory_space<vmem>>, vector<8x16xbf16>
    %cst_21 = arith.constant dense<0.000000e+00> : vector<8x8xf32>
    %59 = tpu.matmul %48, %56, %cst_21 {dimension_numbers = #tpu.dot_dimension_numbers<[1], [1], [0], [0], [0, 0, 1, 0], [], []>} : vector<8x16xbf16>, vector<8x16xbf16>, vector<8x8xf32> -> vector<8x8xf32>
    %60 = arith.addf %59, %10 : vector<8x8xf32>
    %cst_22 = arith.constant dense<0xFF800000> : vector<8xf32>
    %61 = vector.multi_reduction <maximumf>, %60, %cst_22 [1] : vector<8x8xf32> to vector<8xf32>
    %62 = vector.shape_cast %61 : vector<8xf32> to vector<8x1xf32>
    %63 = arith.maximumf %54#0, %62 : vector<8x1xf32>
    %64 = arith.subf %54#0, %63 : vector<8x1xf32>
    %65 = math.exp %64 : vector<8x1xf32>
    %66 = vector.broadcast %63 : vector<8x1xf32> to vector<8x8xf32>
    %67 = arith.subf %60, %66 : vector<8x8xf32>
    %68 = math.exp %67 : vector<8x8xf32>
    %69 = arith.mulf %65, %54#1 : vector<8x1xf32>
    %cst_23 = arith.constant dense<0.000000e+00> : vector<8xf32>
    %70 = vector.multi_reduction <add>, %68, %cst_23 [1] : vector<8x8xf32> to vector<8xf32>
    %71 = vector.shape_cast %70 : vector<8xf32> to vector<8x1xf32>
    %72 = arith.addf %69, %71 : vector<8x1xf32>
    %73 = vector.broadcast %65 : vector<8x1xf32> to vector<8x16xf32>
    %74 = arith.mulf %73, %54#2 : vector<8x16xf32>
    %75 = arith.truncf %68 : vector<8x8xf32> to vector<8x8xbf16>
    %cst_24 = arith.constant dense<0.000000e+00> : vector<8x16xf32>
    %76 = tpu.matmul %75, %58, %cst_24 {dimension_numbers = #tpu.dot_dimension_numbers<[1], [0], [0], [1], [0, 0, 1, 1], [], []>} : vector<8x8xbf16>, vector<8x16xbf16>, vector<8x16xf32> -> vector<8x16xf32>
    %77 = arith.addf %74, %76 : vector<8x16xf32>
    %78 = tpu.reciprocal %72 {approx = true} : vector<8x1xf32> -> vector<8x1xf32>
    %79 = vector.broadcast %78 : vector<8x1xf32> to vector<8x16xf32>
    %80 = arith.mulf %77, %79 : vector<8x16xf32>
    %81 = arith.truncf %80 : vector<8x16xf32> to vector<8x16xbf16>
    %c0_25 = arith.constant 0 : index
    %c16_26 = arith.constant 16 : index
    %82 = vector.load %arg10[%c0_25, %c16_26] : memref<8x64xbf16, #tpu.memory_space<vmem>>, vector<8x16xbf16>
    tpu.vector_store %arg10[%c0_25, %c16_26], %81 {strides = array<i32>} : memref<8x64xbf16, #tpu.memory_space<vmem>>, vector<8x16xbf16>,
    %83 = arith.index_cast %4 : i32 to index
    %c32 = arith.constant 32 : index
    %84 = vector.load %arg7[%83, %c32] : memref<16x64xbf16, #tpu.memory_space<vmem>>, vector<8x16xbf16>
    %cst_27 = arith.constant 0xFF800000 : f32
    %85 = vector.broadcast %cst_27 : f32 to vector<8x1xf32>
    %cst_28 = arith.constant 0.000000e+00 : f32
    %86 = vector.broadcast %cst_28 : f32 to vector<8x1xf32>
    %cst_29 = arith.constant 0.000000e+00 : f32
    %87 = vector.broadcast %cst_29 : f32 to vector<8x16xf32>
    %c0_i32_30 = arith.constant 0 : i32
    %88 = arith.subi %arg1, %c0_i32_30 : i32
    %89 = arith.addi %c0_i32_30, %88 : i32
    %c1_i32_31 = arith.constant 1 : i32
    %90:3 = scf.for %arg11 = %c0_i32_30 to %89 step %c1_i32_31 iter_args(%arg12 = %85, %arg13 = %86, %arg14 = %87) -> (vector<8x1xf32>, vector<8x1xf32>, vector<8x16xf32>)  : i32 {
      %c8_i32_63 = arith.constant 8 : i32
      %164 = arith.muli %arg11, %c8_i32_63 : i32
      %165 = tpu.assume_multiple %164, 8 : i32
      %166 = arith.index_cast %165 : i32 to index
      %c32_64 = arith.constant 32 : index
      %167 = vector.load %arg8[%166, %c32_64] : memref<16x64xbf16, #tpu.memory_space<vmem>>, vector<8x16xbf16>
      %168 = arith.index_cast %165 : i32 to index
      %c32_65 = arith.constant 32 : index
      %169 = vector.load %arg9[%168, %c32_65] : memref<16x64xbf16, #tpu.memory_space<vmem>>, vector<8x16xbf16>
      %cst_66 = arith.constant dense<0.000000e+00> : vector<8x8xf32>
      %170 = tpu.matmul %84, %167, %cst_66 {dimension_numbers = #tpu.dot_dimension_numbers<[1], [1], [0], [0], [0, 0, 1, 0], [], []>} : vector<8x16xbf16>, vector<8x16xbf16>, vector<8x8xf32> -> vector<8x8xf32>
      %cst_67 = arith.constant dense<0xFF800000> : vector<8xf32>
      %171 = vector.multi_reduction <maximumf>, %170, %cst_67 [1] : vector<8x8xf32> to vector<8xf32>
      %172 = vector.shape_cast %171 : vector<8xf32> to vector<8x1xf32>
      %173 = arith.maximumf %arg12, %172 : vector<8x1xf32>
      %174 = arith.subf %arg12, %173 : vector<8x1xf32>
      %175 = math.exp %174 : vector<8x1xf32>
      %176 = vector.broadcast %173 : vector<8x1xf32> to vector<8x8xf32>
      %177 = arith.subf %170, %176 : vector<8x8xf32>
      %178 = math.exp %177 : vector<8x8xf32>
      %179 = arith.mulf %175, %arg13 : vector<8x1xf32>
      %cst_68 = arith.constant dense<0.000000e+00> : vector<8xf32>
      %180 = vector.multi_reduction <add>, %178, %cst_68 [1] : vector<8x8xf32> to vector<8xf32>
      %181 = vector.shape_cast %180 : vector<8xf32> to vector<8x1xf32>
      %182 = arith.addf %179, %181 : vector<8x1xf32>
      %183 = vector.broadcast %175 : vector<8x1xf32> to vector<8x16xf32>
      %184 = arith.mulf %183, %arg14 : vector<8x16xf32>
      %185 = arith.truncf %178 : vector<8x8xf32> to vector<8x8xbf16>
      %cst_69 = arith.constant dense<0.000000e+00> : vector<8x16xf32>
      %186 = tpu.matmul %185, %169, %cst_69 {dimension_numbers = #tpu.dot_dimension_numbers<[1], [0], [0], [1], [0, 0, 1, 1], [], []>} : vector<8x8xbf16>, vector<8x16xbf16>, vector<8x16xf32> -> vector<8x16xf32>
      %187 = arith.addf %184, %186 : vector<8x16xf32>
      scf.yield %173, %182, %187 : vector<8x1xf32>, vector<8x1xf32>, vector<8x16xf32>
    }
    %91 = arith.index_cast %4 : i32 to index
    %c32_32 = arith.constant 32 : index
    %92 = vector.load %arg8[%91, %c32_32] : memref<16x64xbf16, #tpu.memory_space<vmem>>, vector<8x16xbf16>
    %93 = arith.index_cast %4 : i32 to index
    %c32_33 = arith.constant 32 : index
    %94 = vector.load %arg9[%93, %c32_33] : memref<16x64xbf16, #tpu.memory_space<vmem>>, vector<8x16xbf16>
    %cst_34 = arith.constant dense<0.000000e+00> : vector<8x8xf32>
    %95 = tpu.matmul %84, %92, %cst_34 {dimension_numbers = #tpu.dot_dimension_numbers<[1], [1], [0], [0], [0, 0, 1, 0], [], []>} : vector<8x16xbf16>, vector<8x16xbf16>, vector<8x8xf32> -> vector<8x8xf32>
    %96 = arith.addf %95, %10 : vector<8x8xf32>
    %cst_35 = arith.constant dense<0xFF800000> : vector<8xf32>
    %97 = vector.multi_reduction <maximumf>, %96, %cst_35 [1] : vector<8x8xf32> to vector<8xf32>
    %98 = vector.shape_cast %97 : vector<8xf32> to vector<8x1xf32>
    %99 = arith.maximumf %90#0, %98 : vector<8x1xf32>
    %100 = arith.subf %90#0, %99 : vector<8x1xf32>
    %101 = math.exp %100 : vector<8x1xf32>
    %102 = vector.broadcast %99 : vector<8x1xf32> to vector<8x8xf32>
    %103 = arith.subf %96, %102 : vector<8x8xf32>
    %104 = math.exp %103 : vector<8x8xf32>
    %105 = arith.mulf %101, %90#1 : vector<8x1xf32>
    %cst_36 = arith.constant dense<0.000000e+00> : vector<8xf32>
    %106 = vector.multi_reduction <add>, %104, %cst_36 [1] : vector<8x8xf32> to vector<8xf32>
    %107 = vector.shape_cast %106 : vector<8xf32> to vector<8x1xf32>
    %108 = arith.addf %105, %107 : vector<8x1xf32>
    %109 = vector.broadcast %101 : vector<8x1xf32> to vector<8x16xf32>
    %110 = arith.mulf %109, %90#2 : vector<8x16xf32>
    %111 = arith.truncf %104 : vector<8x8xf32> to vector<8x8xbf16>
    %cst_37 = arith.constant dense<0.000000e+00> : vector<8x16xf32>
    %112 = tpu.matmul %111, %94, %cst_37 {dimension_numbers = #tpu.dot_dimension_numbers<[1], [0], [0], [1], [0, 0, 1, 1], [], []>} : vector<8x8xbf16>, vector<8x16xbf16>, vector<8x16xf32> -> vector<8x16xf32>
    %113 = arith.addf %110, %112 : vector<8x16xf32>
    %114 = tpu.reciprocal %108 {approx = true} : vector<8x1xf32> -> vector<8x1xf32>
    %115 = vector.broadcast %114 : vector<8x1xf32> to vector<8x16xf32>
    %116 = arith.mulf %113, %115 : vector<8x16xf32>
    %117 = arith.truncf %116 : vector<8x16xf32> to vector<8x16xbf16>
    %c0_38 = arith.constant 0 : index
    %c32_39 = arith.constant 32 : index
    %118 = vector.load %arg10[%c0_38, %c32_39] : memref<8x64xbf16, #tpu.memory_space<vmem>>, vector<8x16xbf16>
    tpu.vector_store %arg10[%c0_38, %c32_39], %117 {strides = array<i32>} : memref<8x64xbf16, #tpu.memory_space<vmem>>, vector<8x16xbf16>,
    %119 = arith.index_cast %4 : i32 to index
    %c48 = arith.constant 48 : index
    %120 = vector.load %arg7[%119, %c48] : memref<16x64xbf16, #tpu.memory_space<vmem>>, vector<8x16xbf16>
    %cst_40 = arith.constant 0xFF800000 : f32
    %121 = vector.broadcast %cst_40 : f32 to vector<8x1xf32>
    %cst_41 = arith.constant 0.000000e+00 : f32
    %122 = vector.broadcast %cst_41 : f32 to vector<8x1xf32>
    %cst_42 = arith.constant 0.000000e+00 : f32
    %123 = vector.broadcast %cst_42 : f32 to vector<8x16xf32>
    %c0_i32_43 = arith.constant 0 : i32
    %124 = arith.subi %arg1, %c0_i32_43 : i32
    %125 = arith.addi %c0_i32_43, %124 : i32
    %c1_i32_44 = arith.constant 1 : i32
    %126:3 = scf.for %arg11 = %c0_i32_43 to %125 step %c1_i32_44 iter_args(%arg12 = %121, %arg13 = %122, %arg14 = %123) -> (vector<8x1xf32>, vector<8x1xf32>, vector<8x16xf32>)  : i32 {
      %c8_i32_63 = arith.constant 8 : i32
      %164 = arith.muli %arg11, %c8_i32_63 : i32
      %165 = tpu.assume_multiple %164, 8 : i32
      %166 = arith.index_cast %165 : i32 to index
      %c48_64 = arith.constant 48 : index
      %167 = vector.load %arg8[%166, %c48_64] : memref<16x64xbf16, #tpu.memory_space<vmem>>, vector<8x16xbf16>
      %168 = arith.index_cast %165 : i32 to index
      %c48_65 = arith.constant 48 : index
      %169 = vector.load %arg9[%168, %c48_65] : memref<16x64xbf16, #tpu.memory_space<vmem>>, vector<8x16xbf16>
      %cst_66 = arith.constant dense<0.000000e+00> : vector<8x8xf32>
      %170 = tpu.matmul %120, %167, %cst_66 {dimension_numbers = #tpu.dot_dimension_numbers<[1], [1], [0], [0], [0, 0, 1, 0], [], []>} : vector<8x16xbf16>, vector<8x16xbf16>, vector<8x8xf32> -> vector<8x8xf32>
      %cst_67 = arith.constant dense<0xFF800000> : vector<8xf32>
      %171 = vector.multi_reduction <maximumf>, %170, %cst_67 [1] : vector<8x8xf32> to vector<8xf32>
      %172 = vector.shape_cast %171 : vector<8xf32> to vector<8x1xf32>
      %173 = arith.maximumf %arg12, %172 : vector<8x1xf32>
      %174 = arith.subf %arg12, %173 : vector<8x1xf32>
      %175 = math.exp %174 : vector<8x1xf32>
      %176 = vector.broadcast %173 : vector<8x1xf32> to vector<8x8xf32>
      %177 = arith.subf %170, %176 : vector<8x8xf32>
      %178 = math.exp %177 : vector<8x8xf32>
      %179 = arith.mulf %175, %arg13 : vector<8x1xf32>
      %cst_68 = arith.constant dense<0.000000e+00> : vector<8xf32>
      %180 = vector.multi_reduction <add>, %178, %cst_68 [1] : vector<8x8xf32> to vector<8xf32>
      %181 = vector.shape_cast %180 : vector<8xf32> to vector<8x1xf32>
      %182 = arith.addf %179, %181 : vector<8x1xf32>
      %183 = vector.broadcast %175 : vector<8x1xf32> to vector<8x16xf32>
      %184 = arith.mulf %183, %arg14 : vector<8x16xf32>
      %185 = arith.truncf %178 : vector<8x8xf32> to vector<8x8xbf16>
      %cst_69 = arith.constant dense<0.000000e+00> : vector<8x16xf32>
      %186 = tpu.matmul %185, %169, %cst_69 {dimension_numbers = #tpu.dot_dimension_numbers<[1], [0], [0], [1], [0, 0, 1, 1], [], []>} : vector<8x8xbf16>, vector<8x16xbf16>, vector<8x16xf32> -> vector<8x16xf32>
      %187 = arith.addf %184, %186 : vector<8x16xf32>
      scf.yield %173, %182, %187 : vector<8x1xf32>, vector<8x1xf32>, vector<8x16xf32>
    }
    %127 = arith.index_cast %4 : i32 to index
    %c48_45 = arith.constant 48 : index
    %128 = vector.load %arg8[%127, %c48_45] : memref<16x64xbf16, #tpu.memory_space<vmem>>, vector<8x16xbf16>
    %129 = arith.index_cast %4 : i32 to index
    %c48_46 = arith.constant 48 : index
    %130 = vector.load %arg9[%129, %c48_46] : memref<16x64xbf16, #tpu.memory_space<vmem>>, vector<8x16xbf16>
    %cst_47 = arith.constant dense<0.000000e+00> : vector<8x8xf32>
    %131 = tpu.matmul %120, %128, %cst_47 {dimension_numbers = #tpu.dot_dimension_numbers<[1], [1], [0], [0], [0, 0, 1, 0], [], []>} : vector<8x16xbf16>, vector<8x16xbf16>, vector<8x8xf32> -> vector<8x8xf32>
    %132 = arith.addf %131, %10 : vector<8x8xf32>
    %cst_48 = arith.constant dense<0xFF800000> : vector<8xf32>
    %133 = vector.multi_reduction <maximumf>, %132, %cst_48 [1] : vector<8x8xf32> to vector<8xf32>
    %134 = vector.shape_cast %133 : vector<8xf32> to vector<8x1xf32>
    %135 = arith.maximumf %126#0, %134 : vector<8x1xf32>
    %136 = arith.subf %126#0, %135 : vector<8x1xf32>
    %137 = math.exp %136 : vector<8x1xf32>
    %138 = vector.broadcast %135 : vector<8x1xf32> to vector<8x8xf32>
    %139 = arith.subf %132, %138 : vector<8x8xf32>
    %140 = math.exp %139 : vector<8x8xf32>
    %141 = arith.mulf %137, %126#1 : vector<8x1xf32>
    %cst_49 = arith.constant dense<0.000000e+00> : vector<8xf32>
    %142 = vector.multi_reduction <add>, %140, %cst_49 [1] : vector<8x8xf32> to vector<8xf32>
    %143 = vector.shape_cast %142 : vector<8xf32> to vector<8x1xf32>
    %144 = arith.addf %141, %143 : vector<8x1xf32>
    %145 = vector.broadcast %137 : vector<8x1xf32> to vector<8x16xf32>
    %146 = arith.mulf %145, %126#2 : vector<8x16xf32>
    %147 = arith.truncf %140 : vector<8x8xf32> to vector<8x8xbf16>
    %cst_50 = arith.constant dense<0.000000e+00> : vector<8x16xf32>
    %148 = tpu.matmul %147, %130, %cst_50 {dimension_numbers = #tpu.dot_dimension_numbers<[1], [0], [0], [1], [0, 0, 1, 1], [], []>} : vector<8x8xbf16>, vector<8x16xbf16>, vector<8x16xf32> -> vector<8x16xf32>
    %149 = arith.addf %146, %148 : vector<8x16xf32>
    %150 = tpu.reciprocal %144 {approx = true} : vector<8x1xf32> -> vector<8x1xf32>
    %151 = vector.broadcast %150 : vector<8x1xf32> to vector<8x16xf32>
    %152 = arith.mulf %149, %151 : vector<8x16xf32>
    %153 = arith.truncf %152 : vector<8x16xf32> to vector<8x16xbf16>
    %c0_51 = arith.constant 0 : index
    %c48_52 = arith.constant 48 : index
    %154 = vector.load %arg10[%c0_51, %c48_52] : memref<8x64xbf16, #tpu.memory_space<vmem>>, vector<8x16xbf16>
    tpu.vector_store %arg10[%c0_51, %c48_52], %153 {strides = array<i32>} : memref<8x64xbf16, #tpu.memory_space<vmem>>, vector<8x16xbf16>,
    %c0_53 = arith.constant 0 : index
    %c0_54 = arith.constant 0 : index
    %155 = vector.load %arg10[%c0_53, %c0_54] : memref<8x64xbf16, #tpu.memory_space<vmem>>, vector<8x64xbf16>
    %c0_55 = arith.constant 0 : index
    %c0_56 = arith.constant 0 : index
    %156 = vector.load %arg4[%c0_55, %c0_56] : memref<64x64xbf16, #tpu.memory_space<vmem>>, vector<64x64xbf16>
    %cst_57 = arith.constant dense<0.000000e+00> : vector<8x64xf32>
    %157 = tpu.matmul %155, %156, %cst_57 {dimension_numbers = #tpu.dot_dimension_numbers<[1], [0], [0], [1], [0, 0, 1, 1], [], []>} : vector<8x64xbf16>, vector<64x64xbf16>, vector<8x64xf32> -> vector<8x64xf32>
    %c0_58 = arith.constant 0 : index
    %c0_59 = arith.constant 0 : index
    %158 = vector.load %arg5[%c0_58, %c0_59] : memref<1x64xf32, #tpu.memory_space<vmem>>, vector<1x64xf32>
    %159 = vector.broadcast %158 : vector<1x64xf32> to vector<8x64xf32>
    %160 = arith.addf %157, %159 : vector<8x64xf32>
    %c0_60 = arith.constant 0 : index
    %c0_61 = arith.constant 0 : index
    %c0_62 = arith.constant 0 : index
    %161 = vector.load %arg6[%c0_60, %c0_61, %c0_62] : memref<1x8x64xf32, #tpu.memory_space<vmem>>, vector<1x8x64xf32>
    %162 = vector.shape_cast %161 : vector<1x8x64xf32> to vector<8x64xf32>
    %163 = vector.shape_cast %160 : vector<8x64xf32> to vector<1x8x64xf32>
    tpu.vector_store %arg6[%c0_60, %c0_61, %c0_62], %163 {strides = array<i32>} : memref<1x8x64xf32, #tpu.memory_space<vmem>>, vector<1x8x64xf32>,
    return
  }
  func.func @transform_0(%arg0: i32, %arg1: i32) -> (i32, i32, i32) {
    %c0_i32 = arith.constant 0 : i32
    %c0_i32_0 = arith.constant 0 : i32
    %c0_i32_1 = arith.constant 0 : i32
    return %arg0, %c0_i32, %c0_i32_0 : i32, i32, i32
  }
  func.func @transform_1(%arg0: i32, %arg1: i32) -> (i32, i32) {
    %c0_i32 = arith.constant 0 : i32
    %c0_i32_0 = arith.constant 0 : i32
    %c0_i32_1 = arith.constant 0 : i32
    return %c0_i32, %c0_i32_0 : i32, i32
  }
  func.func @transform_2(%arg0: i32, %arg1: i32) -> (i32, i32) {
    %c0_i32 = arith.constant 0 : i32
    %c0_i32_0 = arith.constant 0 : i32
    %c0_i32_1 = arith.constant 0 : i32
    return %c0_i32, %c0_i32_0 : i32, i32
  }
  func.func @transform_3(%arg0: i32, %arg1: i32) -> (i32, i32) {
    %c0_i32 = arith.constant 0 : i32
    %c0_i32_0 = arith.constant 0 : i32
    %c0_i32_1 = arith.constant 0 : i32
    return %c0_i32, %c0_i32_0 : i32, i32
  }
  func.func @transform_4(%arg0: i32, %arg1: i32) -> (i32, i32, i32) {
    %c0_i32 = arith.constant 0 : i32
    %c0_i32_0 = arith.constant 0 : i32
    return %arg0, %arg1, %c0_i32 : i32, i32, i32
  }
}

</mosaic_0001>

<bundles_post_ra>
// kernel: multi_head_attention.1
= control target key start
LH: loop header
LB: loop body
LE: loop exit
PB: predicated region body
PF: predicated region fallthrough
CT: control target
= control target key end

     0   :  { %s2866_s0 = inlined_call_operand.hbm [shape: f32[2,16,64], index: 0, kind: input, shape index: {}]   ;;  %s2867_s1 = inlined_call_operand.hbm [shape: bf16[64,192], index: 1, kind: input, shape index: {}]   ;;  %s2868_s2 = inlined_call_operand.hbm [shape: bf16[64,64], index: 2, kind: input, shape index: {}]   ;;  %s2869_s3 = inlined_call_operand.hbm [shape: f32[1,64], index: 3, kind: input, shape index: {}]   ;;  %s2870_s4 = inlined_call_operand.hbm [shape: f32[2,16,64], index: 4, kind: output, shape index: {}]  }
   0x1   :  { %2879 = sst [smem:[#allocation24_spill]] %s2867_s1 }
   0x2   :  { %2880 = sst [smem:[#allocation25_spill]] %s2868_s2 }
   0x3   :  { %2881 = sst [smem:[#allocation26_spill]] %s2869_s3 }
   0x4   :  { %2882 = sst [smem:[#allocation27_spill]] %s2870_s4 }
   0x5   :  { %9 = vsyncpa [#allocation7], 0 }
   0x6   :  { %11 = vsyncpa [#allocation7 + $0x1], 0 }
   0x7   :  { %12 = vsyncpa [#allocation10], 0 }
   0x8   :  { %13 = vsyncpa [#allocation13], 0 }
   0x9   :  { %14 = vsyncpa [#allocation8], 0 }
   0xa   :  { %16 = vsyncpa [#allocation8 + $0x1], 0  ;;  %s2379_s15 = smov 0   ;;  %s2381_s16 = smov 0  }
   0xb   :  { %s2383_s17 = smov 0   ;;  %s2385_s18 = smov 0  }
   0xc   :  { %s2387_s19 = smov 0   ;;  %s2389_s20 = smov 0  }
   0xd   :  { %s2391_s21 = smov 0   ;;  %s2393_s22 = smov 0  }
   0xe   :  { %s2395_s23 = smov 0   ;;  %s2397_s24 = smov 0  }
   0xf   :  { %s2399_s25 = smov 0  }
  0x10 LB: > { %2883 = sst [smem:[#allocation19_spill]] %s2182_s15  ;;  %s1325_s26 = sadd.s32 4294967295, %s2222_s25   ;;  %s2222_s25 = sphi %s2399_s25, %s22_s25   ;;  %s2218_s24 = sphi %s2397_s24, %s2934_s24   ;;  %s2214_s23 = sphi %s2395_s23, %s2925_s23   ;;  %s2210_s22 = sphi %s2393_s22, %s2933_s22   ;;  %s2206_s21 = sphi %s2391_s21, %s2924_s21   ;;  %s2202_s20 = sphi %s2389_s20, %s2932_s20   ;;  %s2198_s19 = sphi %s2387_s19, %s2931_s19   ;;  %s2194_s18 = sphi %s2385_s18, %s2930_s18   ;;  %s2190_s17 = sphi %s2383_s17, %s2929_s17   ;;  %s2186_s16 = sphi %s2381_s16, %s2928_s16   ;;  %s2182_s15 = sphi %s2379_s15, %s2927_s15  }
  0x11   : > { %2884 = sst [smem:[#allocation20_spill]] %s2214_s23  ;;  %s1326_s27 = sadd.s32 4294967294, %s2222_s25  }
  0x12   : > { %p54_p0 = scmp.ne.s32.totalorder %s2198_s19, %s2194_s18  ;;  %p2435_p1 = scmp.eq.s32.totalorder %s1325_s26, 0 }
  0x13   : > { %p142_p2 = scmp.ne.s32.totalorder %s2190_s17, %s2186_s16  ;;  %p143_p3 = scmp.eq.s32.totalorder %s1325_s26, 3 }
  0x14   : > { %p2443_p4 = por %p2435_p1, %p54_p0  ;;  %p148_p5 = scmp.ne.s32.totalorder %s2186_s16, %s2182_s15 }
  0x15   : > { %p2449_p6 = por %p143_p3, %p142_p2  ;;  %p149_p7 = scmp.eq.s32.totalorder %s1326_s27, 3 }
  0x16   : > { %p1327_p8 = scmp.ge.s32.totalorder %s2222_s25, 1  ;;  %p156_p9 = scmp.lt.s32.totalorder %s2222_s25, 5 }
  0x17   : > { %p2455_p10 = por %p149_p7, %p148_p5  ;;  %s2891_s1 = sld [smem:[#allocation24_spill]] }
  0x18   : > { %p2459_p11 = pnand %p1327_p8, %p156_p9  ;;  %s2336_s10 = smov [#allocation9]  }
  0x19   : > { %s2888_s5 = scalar_select %p2455_p10, 1, 0 }
  0x1a   : > { %p1463_p12 = pneg %p2459_p11  ;;  %s169_s11 = sshll.u32 %s2336_s10, 4  ;;  %s170_s11 = int_to_ptr.vmem [resolvable:$true] %s169_s11 }
  0x1b   : > { %2889 = sst [smem:[#allocation21_spill]] %s2888_s5  ;;  %s2871_s26 = smov 128  }
  0x1c   : > { %p2470_p13 = pnand %p1463_p12, %p2435_p1  ;;  %s2893_s2 = sld [smem:[#allocation25_spill]] }
  0x1d   : > { %s167_s9 = sshll.u32 %s2891_s1, 4  ;;  %s2872_s27 = smov 8   ;;  %s168_s9 = int_to_ptr.hbm [resolvable:$true] %s167_s9 }
  0x1e   : > { %1466 = dma.hbm_to_vmem [thread:$0]  (!%p2470_p13), %s168_s9, 1024, %s170_s11, [#allocation10], %s2871_s26, %s2871_s26, %s2872_s27  }
  0x1f   : > { %s2339_s7 = smov [#allocation11]   ;;  %s2894_s3 = sld [smem:[#allocation26_spill]] }
  0x20   : > { %s183_s8 = sshll.u32 %s2339_s7, 4  ;;  %s2340_s1 = smov 64   ;;  %s184_s8 = int_to_ptr.vmem [resolvable:$true] %s183_s8 }
  0x21   : > { %s2342_s9 = smov [#allocation12]   ;;  %s31_s7 = sadd.s32 1, %s2214_s23 }
  0x22   : > { %s181_s18 = sshll.u32 %s2893_s2, 4  ;;  %s2341_s2 = smov 4   ;;  %s182_s18 = int_to_ptr.hbm [resolvable:$true] %s181_s18 }
  0x23   : > { %1469 = dma.hbm_to_vmem [thread:$0]  (!%p2470_p13), %s182_s18, 512, %s184_s8, [#allocation10], %s2340_s1, %s2340_s1, %s2341_s2  }
  0x24   : > { %s198_s11 = sshll.u32 %s2342_s9, 4  ;;  %s34_s26 = sadd.s32 1, %s2218_s24  ;;  %s199_s11 = int_to_ptr.vmem [resolvable:$true] %s198_s11 }
  0x25   : > { %s196_s14 = sshll.u32 %s2894_s3, 4  ;;  %p32_p0 = scmp.ge.s32.totalorder %s31_s7, 2  ;;  %s197_s14 = int_to_ptr.hbm [resolvable:$true] %s196_s14 }
  0x26   : > { %1472 = dma.hbm_to_vmem [thread:$0]  (!%p2470_p13), %s197_s14, 16, %s199_s11, [#allocation13]  }
  0x27   : > { %s41_s10 = sadd.s32 1, %s2202_s20  ;;  %p48_p2 = scmp.ne.s32.totalorder %s2202_s20, %s2198_s19 }
  0x28   : > { %p49_p3 = scmp.eq.s32.totalorder %s2222_s25, 0  ;;  %s2936_s7 = smov (%p32_p0, %s31_s7), 0 }
  0x29   : > { %2895 = sst [smem:[#allocation22_spill]] %s2936_s7  ;;  %s2938_s26 = smov (!%p32_p0, %s34_s26), %s2218_s24 }
  0x2a   : > { %p2498_p5 = por %p49_p3, %p48_p2  ;;  %s128_s2 = ssub.s32 %s2214_s23, %s2936_s7 }
  0x2b   : > { %p36_p7 = scmp.ge.s32.totalorder %s2938_s26, 2  ;;  %s132_s12 = sadd.s32 1, %s2190_s17 }
  0x2c   : > { %p1484_p8 = scmp.lt.s32.totalorder %s2222_s25, 4  ;;  %s209_s18 = sand.u32 1, %s2202_s20  }
  0x2d   : > { %s2940_s26 = smov (%p36_p7, %s2938_s26), 0  ;;  %s1332_s8 = sshll.u32 %s209_s18, 4 }
  0x2e   : > { %2897 = sst [smem:[#allocation23_spill]] %s2940_s26  ;;  %s38_s13 = ssub.s32 %s2218_s24, %s2940_s26 }
  0x2f   : > { %p39_p9 = scmp.eq.s32.totalorder %s38_s13, 0  ;;  %s129_s14 = sor.u32 %s128_s2, %s38_s13 }
  0x30   : > { %p130_p12 = scmp.eq.s32.totalorder %s129_s14, 0  ;;  %s1434_s9 = sshll.u32 %s2218_s24, 4 }
  0x31   : > { %s2513_s11 = scalar_select %p39_p9, %s2202_s20, %s41_s10  }
  0x32   : > { %s2516_s27 = scalar_select %p130_p12, %s2190_s17, %s132_s12  }
  0x33   : > { %s218_s23 = scalar_lea.hbm %s2866_s0, %s1434_s9  ;;  %s213_s5 = scalar_lea.vmem [#allocation6], %s1332_s8 }
  0x34   : > { %s221_s15 = sshll.u32 %s213_s5, 4  ;;  %s219_s4 = sshll.u32 %s218_s23, 4  ;;  %s222_s15 = int_to_ptr.vmem [resolvable:$true] %s221_s15  ;;  %s220_s4 = int_to_ptr.hbm [resolvable:$true] %s219_s4 }
  0x35   : > { %p1474_p13 = pnand %p1484_p8, %p2498_p5  ;;  %s210_s26 = scalar_lea.sflag [#allocation7], %s209_s18 }
  0x36   : > { %s2898_s2 = smov 8   ;;  %s2899_s13 = smov 128  }
  0x37   : > { %1476 = dma.hbm_to_vmem [thread:$0]  (!%p1474_p13), %s220_s4, 256, %s222_s15, %s210_s26, %s2899_s13, %s2899_s13, %s2898_s2  }
  0x38   : > { %233 = sbr.rel (%p2459_p11) target bundleno = 4796 (0x12bc), region = 36  ;;  %s235_s3 = sand.u32 (!%p2459_p11), 1, %s2198_s19  }
  0x39   : > { %s2531_s7 = sshll.u32 (!%p2459_p11), %s235_s3, 4  ;;  %s236_s23 = scalar_lea.sflag (!%p2459_p11), [#allocation7], %s235_s3 }
  0x3a   : > { %s239_s5 = scalar_lea.vmem (!%p2459_p11), [#allocation6], %s2531_s7 }
  0x3d   : > { %2165 = dma.done.wait (%p2443_p4), %s236_s23, 256  }
  0x3e   : > { %2167 = vsyncadd (%p2443_p4), %s236_s23, 4294967040 }
  0x3f   : > { %2169 = dma.done.wait (%p2435_p1), [#allocation10], 1536  }
  0x40   : > { %2171 = vsyncadd (%p2435_p1), [#allocation10], 4294965760 }
  0x41   : > { %2173 = dma.done.wait (%p2435_p1), [#allocation13], 16  }
  0x42   : > { %2175 = vsyncadd (%p2435_p1), [#allocation13], 4294967280  ;;  %s277_s4 = sand.u32 1, %s2186_s16   ;;  %p1341_p4 = scmp.ne.s32.totalorder %s2206_s21, 0 }
  0x43   : > { %s2549_s15 = sshll.u32 %s277_s4, 3  ;;  %s2343_s28 = smov (!%p1341_p4), 64  }
  0x44   : > { %s279_s29 = scalar_lea.vmem [#allocation14], %s2549_s15  ;;  %284 = sbr.rel (%p1341_p4) target bundleno = 343 (0x157), region = 56 }
  0x49   : > { %v1368_v0 = vld [vmem:[#allocation9 + $0x30] sm:$0xf]  ;;  %v1442_v1 = vld [vmem:[#allocation9 + $0x34] sm:$0xf0]  ;;  %v1360_v2 = vld [vmem:[#allocation9 + $0x20] sm:$0xf] }
  0x4a   : > { %v1369_v3 = vor.u32 %v1442_v1, %v1368_v0  ;;  %v1440_v4 = vld [vmem:[#allocation9 + $0x24] sm:$0xf0]  ;;  %v1352_v6 = vld [vmem:[#allocation9 + $0x10] sm:$0xf]  ;;  %v1441_v7 = vld [vmem:[#allocation9 + $0x34] sm:$0xf] }
  0x4b   : > { %v1361_v5 = vor.u32 %v1440_v4, %v1360_v2  ;;  %v1370_v8 = vld [vmem:[#allocation9 + $0x38] sm:$0xf0]  ;;  %v1438_v9 = vld [vmem:[#allocation9 + $0x14] sm:$0xf0]  ;;  %v1439_v11 = vld [vmem:[#allocation9 + $0x24] sm:$0xf] }
  0x4c   : > { %344 = vmatpush.bf16.msra.mxu0 %v1369_v3  ;;  %v1373_v10 = vor.u32 %v1441_v7, %v1370_v8  ;;  %v1362_v12 = vld [vmem:[#allocation9 + $0x28] sm:$0xf0]  ;;  %v1353_v14 = vor.u32 %v1438_v9, %v1352_v6  ;;  %v1437_v15 = vld [vmem:[#allocation9 + $0x14] sm:$0xf]  ;;  %v1354_v16 = vld [vmem:[#allocation9 + $0x18] sm:$0xf0] }
  0x4d   : > { %v1365_v13 = vor.u32 %v1439_v11, %v1362_v12  ;;  %v1344_v17 = vld [vmem:[#allocation9] sm:$0xf]  ;;  %v1436_v18 = vld [vmem:[#allocation9 + $0x4] sm:$0xf0]  ;;  %v1357_v20 = vor.u32 %v1437_v15, %v1354_v16  ;;  %v1435_v23 = vld [vmem:[#allocation9 + $0x4] sm:$0xf] }
  0x4e   : > { %358 = vmatpush.bf16.msra.mxu1 %v1373_v10  ;;  %v285_v19 = vld [vmem:[%s239_s5] sm:$0xff]  ;;  %v1345_v21 = vor.u32 %v1436_v18, %v1344_v17  ;;  %v286_v22 = vld [vmem:[%s239_s5 + $0x8] sm:$0xff]  ;;  %vm336_vm0 = vcmask 523264   ;;  %vm370_vm1 = vcmask 519168  }
  0x4f   : > { %v1346_v24 = vld [vmem:[#allocation9 + $0x8] sm:$0xf0]  ;;  %v287_v25 = vpack.c.bf16 %v286_v22, %v285_v19 }
  0x50   : > { %345 = vmatpush.bf16.msra.mxu0 %v1361_v5  ;;  %v1349_v26 = vor.u32 %v1435_v23, %v1346_v24 }
  0x52   : > { %359 = vmatpush.bf16.msra.mxu1 %v1365_v13 }
  0x54   : > { %346 = vmatpush.bf16.msra.mxu0 %v1353_v14 }
  0x56   : > { %360 = vmatpush.bf16.msra.mxu1 %v1357_v20 }
  0x58   : > { %347 = vmatpush.bf16.msra.mxu0 %v1345_v21 }
  0x5a   : > { %361 = vmatpush.bf16.msra.mxu1 %v1349_v26 }
  0x5b   : > { %1374 = vmatmul.msk.bf16.vlgmr.msra.gmra.mxu0 %vm336_vm0, %v287_v25 }
  0x5d   : > { %1375 = vmatmul.msk.bf16.vlgmr.msra.gmra.mxu1 %vm336_vm0, %v287_v25 }
  0xd8   : > { %v349_v27 = vpop.f32.mrf.mxu0 }
  0xd9   : > { %v368_v28 = vpack.c.bf16 %v349_v27, %v349_v27 }
  0xda   : > { %v363_v29 = vpop.f32.mrf.mxu1 }
  0xdb   : > { %371 = vst.msk [vmem:[#allocation2] sm:$0xf] %vm370_vm1, %v368_v28  ;;  %375 = vrot.lane.b32.xlu0 %v368_v28, %s2343_s28  ;;  %v383_v30 = vpack.c.bf16 %v363_v29, %v363_v29 }
  0xdd   : > { %385 = vst.msk [vmem:[#allocation4] sm:$0xf] %vm370_vm1, %v383_v30 }
  0xe0   : > { %v351_v31 = vpop.f32.mrf.mxu0 }
  0xe1   : > { %v369_v32 = vpack.c.bf16 %v351_v31, %v351_v31 }
  0xe2   : > { %v365_v33 = vpop.f32.mrf.mxu1 }
  0xe3   : > { %372 = vst.msk [vmem:[#allocation2 + $0x4] sm:$0xf] %vm370_vm1, %v369_v32  ;;  %377 = vrot.lane.b32.xlu0 %v369_v32, %s2343_s28  ;;  %v384_v34 = vpack.c.bf16 %v365_v33, %v365_v33 }
  0xe5   : > { %386 = vst.msk [vmem:[#allocation4 + $0x4] sm:$0xf] %vm370_vm1, %v384_v34 }
 0x14d   : > { %v376_v35 = vpop.permute.xlu0 %375 }
 0x14e   : > { %381 = vst.msk [vmem:[#allocation3] sm:$0xf] %vm370_vm1, %v376_v35 }
 0x155   : > { %v378_v36 = vpop.permute.xlu0 %377 }
 0x156   : > { %382 = vst.msk [vmem:[#allocation3 + $0x4] sm:$0xf] %vm370_vm1, %v378_v36 }
 0x157 PF: > { %s1376_s6 = sshll.u32 %s2206_s21, 3  ;;  %v388_v37 = vlaneseq  ;;  %v2344_v41 = vmov -1e+30   ;;  %p1378_p1 = scmp.le.s32.totalorder %s2206_s21, 0  ;;  %v2575_v43 = vmov 0.0   ;;  %v2577_v44 = vmov 0.0  }
 0x158   : > { %s394_s26 = sshra.s32 %s1376_s6, 3  ;;  %v2579_v45 = vmov -inf   ;;  %s2583_s12 = smov (!%p1378_p1), 0  }
 0x159   : > { %v389_v38 = vshrl.u32 %v388_v37, 7  ;;  %v391_v39 = vand.u32 127, %v388_v37  ;;  %s2564_s10 = sshll.u32 %s394_s26, 2  ;;  %1212 = sbr.rel (%p1378_p1) target bundleno = 756 (0x2f4), region = 130 }
 0x15a   : > { %s2567_s1 = scalar_lea.vmem [#allocation2], %s2564_s10 }
 0x15b   : > { %vm392_vm2 = vcmp.le.s32.totalorder %v391_v39, %v389_v38  ;;  %v2570_v40 = vld [vmem:[%s2567_s1] sm:$0xf] }
 0x15c   : > { %v2572_v42 = vsel %vm392_vm2, 0.0, %v2344_v41 }
 0x15e   : > { %v2224_v46 = vmov 0.0   ;;  %v2228_v47 = vmov 0.0   ;;  %v2232_v48 = vmov -inf  }
 0x15f LB: >> { %s1379_s18 = sshll.u32 %s2238_s12, 3  ;;  %vm417_vm3 = vcmask 130048   ;;  %vm437_vm4 = vcmask 64512   ;;  %vm458_vm5 = vcmask 1043456   ;;  %s402_s12 = sadd.s32 1, %s2238_s12   ;;  %s2238_s12 = sphi %s2583_s12, %s402_s12   ;;  %v2234_v48 = vphi %v2232_v48, %v2233_v48   ;;  %v2230_v47 = vphi %v2228_v47, %v2229_v47   ;;  %v2226_v46 = vphi %v2224_v46, %v2225_v46  }
 0x160   : >> { %s409_s8 = sshra.s32 %s1379_s18, 3  ;;  %p401_p11 = scmp.ge.s32.totalorder %s402_s12, %s2206_s21 }
 0x161   : >> { %s1380_s14 = sshll.u32 %s409_s8, 2 }
 0x162   : >> { %s412_s9 = scalar_lea.vmem [#allocation3], %s1380_s14  ;;  %s415_s2 = scalar_lea.vmem [#allocation4], %s1380_s14 }
 0x163   : >> { %v413_v49 = vld [vmem:[%s412_s9] sm:$0xf] }
 0x164   : >> { %v422_v50 = vsel %vm417_vm3, %v413_v49, 0  ;;  %v416_v54 = vld [vmem:[%s415_s2] sm:$0xf] }
 0x165   : >> { %431 = vmatpush.bf16.xpose.msra.mxu0 %v422_v50  ;;  %v460_v55 = vsel %vm458_vm5, %v416_v54, 0 }
 0x166   : >> { %469 = vmatpush.bf16.msra.mxu1 %v460_v55 }
 0x16c   : >> { %1382 = vmatmul.msk.bf16.vlgmr.msra.gmra.mxu0 %vm417_vm3, %v2570_v40 }
 0x1e9   : >> { %v433_v51 = vpop.f32.mrf.mxu0 }
 0x1ea   : >> { %v438_v52 = vsel %vm437_vm4, %v433_v51, -inf }
 0x1eb   : >> { %439 = vmax.xlane.f32.xlu0 %v438_v52 }
 0x1f1   : >> { %v435_v53 = vpop.f32.mrf.mxu0 }
 0x25e   : >> { %v440_v56 = vpop.xlane.xlu0 %439 }
 0x25f   : >> { %v441_v57 = vmax.f32 %v2234_v48, %v440_v56  }
 0x261   : >> { %v442_v58 = vsub.f32 %v2234_v48, %v441_v57  ;;  %v445_v59 = vsub.f32 %v433_v51, %v441_v57  ;;  %v2233_v48 = vmov %v441_v57   ;;  %v2902_v45 = vmov (%p401_p11), %v441_v57 }
 0x263   : >> { %v446_v60 = vmul.f32 1.442695, %v445_v59  ;;  %v443_v0 = vmul.f32 1.442695, %v442_v58 }
 0x265   : >> { %1819 = vpow2.f32 %v446_v60 }
 0x266   : >> { %1821 = vpow2.f32 %v443_v0 }
 0x26b   : >> { %v1820_v61 = vpop.eup %1819 }
 0x26c   : >> { %v449_v62 = vsel %vm437_vm4, %v1820_v61, 0.0  ;;  %v454_v63 = vpack.c.bf16 %v1820_v61, %v1820_v61  ;;  %v1822_v1 = vpop.eup %1821 }
 0x26d   : >> { %450 = vadd.xlane.f32.xlu0 %v449_v62  ;;  %v448_v2 = vmul.f32 %v2230_v47, %v1822_v1  ;;  %v453_v5 = vmul.f32 %v2226_v46, %v1822_v1 }
 0x26e   : >> { %1383 = vmatmul.msk.bf16.vlgmr.msra.gmra.mxu1 %vm437_vm4, %v454_v63 }
 0x2e0   : >> { %v451_v3 = vpop.xlane.xlu0 %450 }
 0x2e1   : >> { %v452_v4 = vadd.f32 %v451_v3, %v448_v2  }
 0x2e3   : >> { %v2229_v47 = vmov %v452_v4   ;;  %v2901_v44 = vmov (%p401_p11), %v452_v4 }
 0x2eb   : >> { %v471_v6 = vpop.f32.mrf.mxu1 }
 0x2ec   : >> { %v475_v7 = vadd.f32 %v471_v6, %v453_v5  }
 0x2ee   : >> { %v2225_v46 = vmov %v475_v7   ;;  %v2900_v43 = vmov (%p401_p11), %v475_v7 }
 0x2ef   : > { %404 = sbr.rel (!%p401_p11) target bundleno = 351 (0x15f), region = 136 }
 0x2f3   : >> { %v473_v8 = vpop.f32.mrf.mxu1 }
 0x2f4 PF: > { %vm482_vm6 = vcmask 130048   ;;  %s2607_s13 = scalar_lea.vmem [#allocation3], %s2564_s10  ;;  %vm502_vm7 = vcmask 64512   ;;  %s2616_s3 = scalar_lea.vmem [#allocation4], %s2564_s10  ;;  %vm523_vm8 = vcmask 1043456   ;;  %vm544_vm9 = vcmask 125952   ;;  %v2250_v45 = vphi %v2579_v45, %v2902_v45   ;;  %v2246_v44 = vphi %v2577_v44, %v2901_v44   ;;  %v2242_v43 = vphi %v2575_v43, %v2900_v43  }
 0x2f5   : > { %v478_v9 = vld [vmem:[%s2607_s13] sm:$0xf]  ;;  %v2625_v38 = vmov 0.0   ;;  %v2627_v39 = vmov 0.0   ;;  %s2639_s7 = smov (!%p1378_p1), 0  }
 0x2f6   : > { %v487_v10 = vsel %vm482_vm6, %v478_v9, 0  ;;  %v481_v15 = vld [vmem:[%s2616_s3] sm:$0xf] }
 0x2f7   : > { %496 = vmatpush.bf16.xpose.msra.mxu0 %v487_v10  ;;  %v525_v16 = vsel %vm523_vm8, %v481_v15, 0  ;;  %v2623_v25 = vld [vmem:[%s2567_s1] sm:$0xf] }
 0x2f8   : > { %534 = vmatpush.bf16.msra.mxu1 %v525_v16 }
 0x2fe   : > { %1386 = vmatmul.msk.bf16.vlgmr.msra.gmra.mxu0 %vm482_vm6, %v2570_v40  ;;  %v2629_v40 = vmov -inf  }
 0x37b   : > { %v498_v11 = vpop.f32.mrf.mxu0 }
 0x37c   : > { %v499_v12 = vadd.f32 %v498_v11, %v2572_v42 }
 0x37e   : > { %v503_v13 = vsel %vm502_vm7, %v499_v12, -inf }
 0x37f   : > { %504 = vmax.xlane.f32.xlu0 %v503_v13 }
 0x383   : > { %v500_v14 = vpop.f32.mrf.mxu0 }
 0x3f2   : > { %v505_v17 = vpop.xlane.xlu0 %504 }
 0x3f3   : > { %v506_v18 = vmax.f32 %v2250_v45, %v505_v17 }
 0x3f5   : > { %v510_v19 = vsub.f32 %v499_v12, %v506_v18  ;;  %v507_v24 = vsub.f32 %v2250_v45, %v506_v18 }
 0x3f7   : > { %v511_v20 = vmul.f32 1.442695, %v510_v19  ;;  %v508_v26 = vmul.f32 1.442695, %v507_v24 }
 0x3f9   : > { %1823 = vpow2.f32 %v511_v20 }
 0x3fa   : > { %1825 = vpow2.f32 %v508_v26 }
 0x3ff   : > { %v1824_v21 = vpop.eup %1823 }
 0x400   : > { %v514_v22 = vsel %vm502_vm7, %v1824_v21, 0.0  ;;  %v519_v23 = vpack.c.bf16 %v1824_v21, %v1824_v21  ;;  %v1826_v27 = vpop.eup %1825 }
 0x401   : > { %515 = vadd.xlane.f32.xlu0 %v514_v22  ;;  %v513_v29 = vmul.f32 %v2246_v44, %v1826_v27  ;;  %v518_v31 = vmul.f32 %v2242_v43, %v1826_v27 }
 0x402   : > { %1387 = vmatmul.msk.bf16.vlgmr.msra.gmra.mxu1 %vm502_vm7, %v519_v23 }
 0x474   : > { %v516_v28 = vpop.xlane.xlu0 %515 }
 0x475   : > { %v517_v30 = vadd.f32 %v516_v28, %v513_v29 }
 0x477   : > { %1827 = vrcp.f32 %v517_v30 }
 0x47d   : > { %v1828_v34 = vpop.eup %1827 }
 0x47f   : > { %v536_v32 = vpop.f32.mrf.mxu1 }
 0x480   : > { %v540_v33 = vadd.f32 %v536_v32, %v518_v31 }
 0x482   : > { %v542_v35 = vmul.f32 %v1828_v34, %v540_v33 }
 0x483   : > { %1226 = sbr.rel (%p1378_p1) target bundleno = 1698 (0x6a2), region = 141 }
 0x484   : > { %v543_v36 = vpack.c.bf16 %v542_v35, %v542_v35 }
 0x486   : > { %545 = vst.msk [vmem:[#allocation5] sm:$0xf] %vm544_vm9, %v543_v36 }
 0x487   : > { %v538_v37 = vpop.f32.mrf.mxu1 }
 0x488   : > { %v2633_v41 = vmov 0.0   ;;  %v2635_v43 = vmov 0.0   ;;  %v2637_v44 = vmov -inf  }
 0x489 LB: >> { %s1389_s23 = sshll.u32 %s2266_s7, 3  ;;  %s2345_s26 = smov 112   ;;  %v566_v48 = vunpack.c.l.b16 %v2623_v25  ;;  %s2266_s7 = sphi %s2639_s7, %s550_s7   ;;  %v2262_v44 = vphi %v2637_v44, %v2905_v44   ;;  %v2258_v43 = vphi %v2635_v43, %v2904_v43   ;;  %v2254_v41 = vphi %v2633_v41, %v2903_v41  }
 0x48a   : >> { %s557_s5 = sshra.s32 %s1389_s23, 3  ;;  %s550_s7 = sadd.s32 1, %s2266_s7  }
 0x48b   : >> { %s1390_s28 = sshll.u32 %s557_s5, 2  ;;  %v567_v49 = vpack.c.b16 %v566_v48, %v566_v48  ;;  %p549_p0 = scmp.ge.s32.totalorder %s550_s7, %s2206_s21 }
 0x48c   : >> { %s560_s6 = scalar_lea.vmem [#allocation3], %s1390_s28  ;;  %s563_s10 = scalar_lea.vmem [#allocation4], %s1390_s28 }
 0x48d   : >> { %v561_v45 = vld [vmem:[%s560_s6] sm:$0xf] }
 0x48e   : >> { %v571_v46 = vunpack.c.l.b16 %v561_v45  ;;  %v564_v56 = vld [vmem:[%s563_s10] sm:$0xf] }
 0x48f   : >> { %v612_v57 = vunpack.c.l.b16 %v564_v56 }
 0x490   : >> { %v572_v47 = vpack.c.b16 %v571_v46, %v571_v46 }
 0x491   : >> { %v613_v58 = vpack.c.b16 %v612_v57, %v612_v57 }
 0x492   : >> { %573 = vrot.lane.b32.xlu0 %v572_v47, %s2345_s26 }
 0x49a   : >> { %568 = vrot.lane.b32.xlu0 %v567_v49, %s2345_s26 }
 0x504   : >> { %v574_v50 = vpop.permute.xlu0 %573 }
 0x505   : >> { %v579_v51 = vsel %vm482_vm6, %v574_v50, 0 }
 0x506   : >> { %588 = vmatpush.bf16.xpose.msra.mxu0 %v579_v51 }
 0x50c   : >> { %v569_v52 = vpop.permute.xlu0 %568 }
 0x50d   : >> { %1392 = vmatmul.msk.bf16.vlgmr.msra.gmra.mxu0 %vm482_vm6, %v569_v52 }
 0x58a   : >> { %v590_v53 = vpop.f32.mrf.mxu0 }
 0x58b   : >> { %v594_v54 = vsel %vm502_vm7, %v590_v53, -inf }
 0x58c   : >> { %595 = vmax.xlane.f32.xlu1 %v594_v54 }
 0x592   : >> { %v592_v55 = vpop.f32.mrf.mxu0 }
 0x5a5   : >> { %614 = vrot.lane.b32.xlu1 %v613_v58, %s2345_s26 }
 0x5ff   : >> { %v596_v59 = vpop.xlane.xlu1 %595 }
 0x600   : >> { %v597_v60 = vmax.f32 %v2262_v44, %v596_v59  }
 0x602   : >> { %v598_v61 = vsub.f32 %v2262_v44, %v597_v60  ;;  %v601_v62 = vsub.f32 %v590_v53, %v597_v60  ;;  %v2905_v44 = vmov %v597_v60  ;;  %v2908_v40 = vmov (%p549_p0), %v597_v60 }
 0x604   : >> { %v602_v63 = vmul.f32 1.442695, %v601_v62  ;;  %v599_v5 = vmul.f32 1.442695, %v598_v61 }
 0x606   : >> { %1829 = vpow2.f32 %v602_v63 }
 0x607   : >> { %1831 = vpow2.f32 %v599_v5 }
 0x60c   : >> { %v1830_v0 = vpop.eup %1829 }
 0x60d   : >> { %v605_v1 = vsel %vm502_vm7, %v1830_v0, 0.0  ;;  %v610_v4 = vpack.c.bf16 %v1830_v0, %v1830_v0  ;;  %v1832_v6 = vpop.eup %1831 }
 0x60e   : >> { %606 = vadd.xlane.f32.xlu2 %v605_v1  ;;  %v604_v7 = vmul.f32 %v2258_v43, %v1832_v6  ;;  %v609_v10 = vmul.f32 %v2254_v41, %v1832_v6 }
 0x617   : >> { %v615_v2 = vpop.permute.xlu1 %614 }
 0x618   : >> { %v620_v3 = vsel %vm523_vm8, %v615_v2, 0 }
 0x619   : >> { %629 = vmatpush.bf16.msra.mxu1 %v620_v3 }
 0x61c   : >> { %1393 = vmatmul.msk.bf16.vlgmr.msra.gmra.mxu1 %vm502_vm7, %v610_v4 }
 0x681   : >> { %v607_v8 = vpop.xlane.xlu2 %606 }
 0x682   : >> { %v608_v9 = vadd.f32 %v607_v8, %v604_v7  }
 0x684   : >> { %v2904_v43 = vmov %v608_v9  ;;  %v2907_v39 = vmov (%p549_p0), %v608_v9 }
 0x699   : >> { %v631_v11 = vpop.f32.mrf.mxu1 }
 0x69a   : >> { %v635_v12 = vadd.f32 %v631_v11, %v609_v10  }
 0x69c   : >> { %v2903_v41 = vmov %v635_v12  ;;  %v2906_v38 = vmov (%p549_p0), %v635_v12 }
 0x69d   : > { %552 = sbr.rel (!%p549_p0) target bundleno = 1161 (0x489), region = 147 }
 0x6a1   : >> { %v633_v13 = vpop.f32.mrf.mxu1 }
 0x6a2 PF: > { %v636_v14 = vld [vmem:[%s2607_s13] sm:$0xf]  ;;  %s2346_s12 = smov 112   ;;  %v639_v17 = vunpack.c.l.b16 %v2623_v25  ;;  %s2347_s18 = smov 16   ;;  %vm716_vm10 = vcmask 257152   ;;  %v2687_v56 = vmov 0.0   ;;  %v2278_v40 = vphi %v2629_v40, %v2908_v40   ;;  %v2274_v39 = vphi %v2627_v39, %v2907_v39   ;;  %v2270_v38 = vphi %v2625_v38, %v2906_v38  }
 0x6a3   : > { %v644_v15 = vunpack.c.l.b16 %v636_v14  ;;  %v637_v27 = vld [vmem:[%s2616_s3] sm:$0xf]  ;;  %v2691_v57 = vmov -inf   ;;  %s2701_s8 = smov (!%p1378_p1), 0  }
 0x6a4   : > { %v640_v18 = vpack.c.b16 %v639_v17, %v639_v17  ;;  %v685_v28 = vunpack.c.l.b16 %v637_v27  ;;  %v2685_v55 = vld [vmem:[%s2567_s1] sm:$0xf] }
 0x6a5   : > { %v645_v16 = vpack.c.b16 %v644_v15, %v644_v15 }
 0x6a6   : > { %v686_v29 = vpack.c.b16 %v685_v28, %v685_v28 }
 0x6a7   : > { %646 = vrot.lane.b32.xlu0 %v645_v16, %s2346_s12 }
 0x6af   : > { %641 = vrot.lane.b32.xlu0 %v640_v18, %s2346_s12 }
 0x719   : > { %v647_v19 = vpop.permute.xlu0 %646 }
 0x71a   : > { %v652_v20 = vsel %vm482_vm6, %v647_v19, 0 }
 0x71b   : > { %661 = vmatpush.bf16.xpose.msra.mxu0 %v652_v20 }
 0x721   : > { %v642_v21 = vpop.permute.xlu0 %641 }
 0x722   : > { %1394 = vmatmul.msk.bf16.vlgmr.msra.gmra.mxu0 %vm482_vm6, %v642_v21 }
 0x79f   : > { %v663_v22 = vpop.f32.mrf.mxu0 }
 0x7a0   : > { %v664_v23 = vadd.f32 %v663_v22, %v2572_v42 }
 0x7a2   : > { %v667_v24 = vsel %vm502_vm7, %v664_v23, -inf }
 0x7a3   : > { %668 = vmax.xlane.f32.xlu1 %v667_v24 }
 0x7a7   : > { %v665_v26 = vpop.f32.mrf.mxu0 }
 0x7bc   : > { %687 = vrot.lane.b32.xlu1 %v686_v29, %s2346_s12 }
 0x816   : > { %v669_v25 = vpop.xlane.xlu1 %668 }
 0x817   : > { %v670_v30 = vmax.f32 %v2278_v40, %v669_v25 }
 0x819   : > { %v674_v31 = vsub.f32 %v664_v23, %v670_v30  ;;  %v671_v41 = vsub.f32 %v2278_v40, %v670_v30 }
 0x81b   : > { %v675_v32 = vmul.f32 1.442695, %v674_v31  ;;  %v672_v43 = vmul.f32 1.442695, %v671_v41 }
 0x81d   : > { %1833 = vpow2.f32 %v675_v32 }
 0x81e   : > { %1835 = vpow2.f32 %v672_v43 }
 0x823   : > { %v1834_v33 = vpop.eup %1833 }
 0x824   : > { %v678_v34 = vsel %vm502_vm7, %v1834_v33, 0.0  ;;  %v683_v37 = vpack.c.bf16 %v1834_v33, %v1834_v33  ;;  %v1836_v44 = vpop.eup %1835 }
 0x825   : > { %679 = vadd.xlane.f32.xlu2 %v678_v34  ;;  %v677_v46 = vmul.f32 %v2274_v39, %v1836_v44  ;;  %v682_v48 = vmul.f32 %v2270_v38, %v1836_v44  ;;  %v2689_v39 = vmov 0.0  }
 0x82e   : > { %v688_v35 = vpop.permute.xlu1 %687 }
 0x82f   : > { %v693_v36 = vsel %vm523_vm8, %v688_v35, 0 }
 0x830   : > { %702 = vmatpush.bf16.msra.mxu1 %v693_v36 }
 0x833   : > { %1395 = vmatmul.msk.bf16.vlgmr.msra.gmra.mxu1 %vm502_vm7, %v683_v37 }
 0x898   : > { %v680_v45 = vpop.xlane.xlu2 %679 }
 0x899   : > { %v681_v47 = vadd.f32 %v680_v45, %v677_v46 }
 0x89b   : > { %1837 = vrcp.f32 %v681_v47 }
 0x8a1   : > { %v1838_v51 = vpop.eup %1837 }
 0x8b0   : > { %v704_v49 = vpop.f32.mrf.mxu1 }
 0x8b1   : > { %v708_v50 = vadd.f32 %v704_v49, %v682_v48 }
 0x8b3   : > { %v710_v52 = vmul.f32 %v1838_v51, %v708_v50 }
 0x8b5   : > { %v711_v53 = vpack.c.bf16 %v710_v52, %v710_v52 }
 0x8b7   : > { %713 = vrot.lane.b32.xlu2 %v711_v53, %s2347_s18 }
 0x8b8   : > { %v706_v54 = vpop.f32.mrf.mxu1 }
 0x90e   : > { %1240 = sbr.rel (%p1378_p1) target bundleno = 2861 (0xb2d), region = 152 }
 0x911   : > { %v714_v40 = vpop.permute.xlu2 %713 }
 0x912   : > { %717 = vst.msk [vmem:[#allocation5] sm:$0xf] %vm716_vm10, %v714_v40 }
 0x913   : > { %v2695_v38 = vmov 0.0   ;;  %v2697_v58 = vmov 0.0   ;;  %v2699_v59 = vmov -inf  }
 0x914 LB: >> { %s1397_s14 = sshll.u32 %s2294_s8, 3  ;;  %s2348_s23 = smov 96   ;;  %v738_v63 = vunpack.c.l.b16 %v2685_v55  ;;  %s2294_s8 = sphi %s2701_s8, %s722_s8   ;;  %v2290_v59 = vphi %v2699_v59, %v2911_v59   ;;  %v2286_v58 = vphi %v2697_v58, %v2910_v58   ;;  %v2282_v38 = vphi %v2695_v38, %v2909_v38  }
 0x915   : >> { %s729_s9 = sshra.s32 %s1397_s14, 3  ;;  %s722_s8 = sadd.s32 1, %s2294_s8  }
 0x916   : >> { %s1398_s2 = sshll.u32 %s729_s9, 2  ;;  %v739_v0 = vpack.c.b16 %v738_v63, %v738_v63  ;;  %p721_p2 = scmp.ge.s32.totalorder %s722_s8, %s2206_s21 }
 0x917   : >> { %s732_s7 = scalar_lea.vmem [#allocation3], %s1398_s2  ;;  %s735_s5 = scalar_lea.vmem [#allocation4], %s1398_s2 }
 0x918   : >> { %v733_v60 = vld [vmem:[%s732_s7] sm:$0xf] }
 0x919   : >> { %v743_v61 = vunpack.c.l.b16 %v733_v60  ;;  %v736_v7 = vld [vmem:[%s735_s5] sm:$0xf] }
 0x91a   : >> { %v784_v8 = vunpack.c.l.b16 %v736_v7 }
 0x91b   : >> { %v744_v62 = vpack.c.b16 %v743_v61, %v743_v61 }
 0x91c   : >> { %v785_v9 = vpack.c.b16 %v784_v8, %v784_v8 }
 0x91d   : >> { %745 = vrot.lane.b32.xlu0 %v744_v62, %s2348_s23 }
 0x925   : >> { %740 = vrot.lane.b32.xlu0 %v739_v0, %s2348_s23 }
 0x98f   : >> { %v746_v1 = vpop.permute.xlu0 %745 }
 0x990   : >> { %v751_v2 = vsel %vm482_vm6, %v746_v1, 0 }
 0x991   : >> { %760 = vmatpush.bf16.xpose.msra.mxu0 %v751_v2 }
 0x997   : >> { %v741_v3 = vpop.permute.xlu0 %740 }
 0x998   : >> { %1400 = vmatmul.msk.bf16.vlgmr.msra.gmra.mxu0 %vm482_vm6, %v741_v3 }
 0xa15   : >> { %v762_v4 = vpop.f32.mrf.mxu0 }
 0xa16   : >> { %v766_v5 = vsel %vm502_vm7, %v762_v4, -inf }
 0xa17   : >> { %767 = vmax.xlane.f32.xlu1 %v766_v5 }
 0xa1d   : >> { %v764_v6 = vpop.f32.mrf.mxu0 }
 0xa30   : >> { %786 = vrot.lane.b32.xlu1 %v785_v9, %s2348_s23 }
 0xa8a   : >> { %v768_v10 = vpop.xlane.xlu1 %767 }
 0xa8b   : >> { %v769_v11 = vmax.f32 %v2290_v59, %v768_v10  }
 0xa8d   : >> { %v770_v12 = vsub.f32 %v2290_v59, %v769_v11  ;;  %v773_v13 = vsub.f32 %v762_v4, %v769_v11  ;;  %v2911_v59 = vmov %v769_v11  ;;  %v2914_v57 = vmov (%p721_p2), %v769_v11 }
 0xa8f   : >> { %v774_v14 = vmul.f32 1.442695, %v773_v13  ;;  %v771_v20 = vmul.f32 1.442695, %v770_v12 }
 0xa91   : >> { %1839 = vpow2.f32 %v774_v14 }
 0xa92   : >> { %1841 = vpow2.f32 %v771_v20 }
 0xa97   : >> { %v1840_v15 = vpop.eup %1839 }
 0xa98   : >> { %v777_v16 = vsel %vm502_vm7, %v1840_v15, 0.0  ;;  %v782_v19 = vpack.c.bf16 %v1840_v15, %v1840_v15  ;;  %v1842_v21 = vpop.eup %1841 }
 0xa99   : >> { %778 = vadd.xlane.f32.xlu2 %v777_v16  ;;  %v776_v22 = vmul.f32 %v2286_v58, %v1842_v21  ;;  %v781_v26 = vmul.f32 %v2282_v38, %v1842_v21 }
 0xaa2   : >> { %v787_v17 = vpop.permute.xlu1 %786 }
 0xaa3   : >> { %v792_v18 = vsel %vm523_vm8, %v787_v17, 0 }
 0xaa4   : >> { %801 = vmatpush.bf16.msra.mxu1 %v792_v18 }
 0xaa7   : >> { %1401 = vmatmul.msk.bf16.vlgmr.msra.gmra.mxu1 %vm502_vm7, %v782_v19 }
 0xb0c   : >> { %v779_v23 = vpop.xlane.xlu2 %778 }
 0xb0d   : >> { %v780_v24 = vadd.f32 %v779_v23, %v776_v22  }
 0xb0f   : >> { %v2910_v58 = vmov %v780_v24  ;;  %v2913_v39 = vmov (%p721_p2), %v780_v24 }
 0xb24   : >> { %v803_v27 = vpop.f32.mrf.mxu1 }
 0xb25   : >> { %v807_v28 = vadd.f32 %v803_v27, %v781_v26  }
 0xb27   : >> { %v2909_v38 = vmov %v807_v28  ;;  %v2912_v56 = vmov (%p721_p2), %v807_v28 }
 0xb28   : > { %724 = sbr.rel (!%p721_p2) target bundleno = 2324 (0x914), region = 158 }
 0xb2c   : >> { %v805_v29 = vpop.f32.mrf.mxu1 }
 0xb2d PF: > { %v808_v25 = vld [vmem:[%s2607_s13] sm:$0xf]  ;;  %s2349_s28 = smov 96   ;;  %v811_v32 = vunpack.c.l.b16 %v2685_v55  ;;  %s2350_s6 = smov 32   ;;  %vm888_vm11 = vcmask 388352   ;;  %v2749_v7 = vmov 0.0   ;;  %v2306_v57 = vphi %v2691_v57, %v2914_v57   ;;  %v2302_v39 = vphi %v2689_v39, %v2913_v39   ;;  %v2298_v56 = vphi %v2687_v56, %v2912_v56  }
 0xb2e   : > { %v816_v30 = vunpack.c.l.b16 %v808_v25  ;;  %v809_v45 = vld [vmem:[%s2616_s3] sm:$0xf]  ;;  %v2753_v8 = vmov -inf  }
 0xb2f   : > { %v812_v33 = vpack.c.b16 %v811_v32, %v811_v32  ;;  %v857_v46 = vunpack.c.l.b16 %v809_v45  ;;  %v2747_v6 = vld [vmem:[%s2567_s1] sm:$0xf]  ;;  %s2763_s1 = smov (!%p1378_p1), 0  }
 0xb30   : > { %v817_v31 = vpack.c.b16 %v816_v30, %v816_v30 }
 0xb31   : > { %v858_v47 = vpack.c.b16 %v857_v46, %v857_v46 }
 0xb32   : > { %818 = vrot.lane.b32.xlu0 %v817_v31, %s2349_s28 }
 0xb3a   : > { %813 = vrot.lane.b32.xlu0 %v812_v33, %s2349_s28 }
 0xba4   : > { %v819_v34 = vpop.permute.xlu0 %818 }
 0xba5   : > { %v824_v35 = vsel %vm482_vm6, %v819_v34, 0 }
 0xba6   : > { %833 = vmatpush.bf16.xpose.msra.mxu0 %v824_v35 }
 0xbac   : > { %v814_v36 = vpop.permute.xlu0 %813 }
 0xbad   : > { %1402 = vmatmul.msk.bf16.vlgmr.msra.gmra.mxu0 %vm482_vm6, %v814_v36 }
 0xc2a   : > { %v835_v37 = vpop.f32.mrf.mxu0 }
 0xc2b   : > { %v836_v41 = vadd.f32 %v835_v37, %v2572_v42 }
 0xc2d   : > { %v839_v43 = vsel %vm502_vm7, %v836_v41, -inf }
 0xc2e   : > { %840 = vmax.xlane.f32.xlu1 %v839_v43 }
 0xc32   : > { %v837_v44 = vpop.f32.mrf.mxu0 }
 0xc47   : > { %859 = vrot.lane.b32.xlu1 %v858_v47, %s2349_s28 }
 0xca1   : > { %v841_v48 = vpop.xlane.xlu1 %840 }
 0xca2   : > { %v842_v49 = vmax.f32 %v2306_v57, %v841_v48 }
 0xca4   : > { %v846_v50 = vsub.f32 %v836_v41, %v842_v49  ;;  %v843_v38 = vsub.f32 %v2306_v57, %v842_v49 }
 0xca6   : > { %v847_v51 = vmul.f32 1.442695, %v846_v50  ;;  %v844_v58 = vmul.f32 1.442695, %v843_v38 }
 0xca8   : > { %1843 = vpow2.f32 %v847_v51 }
 0xca9   : > { %1845 = vpow2.f32 %v844_v58 }
 0xcae   : > { %v1844_v52 = vpop.eup %1843 }
 0xcaf   : > { %v850_v53 = vsel %vm502_vm7, %v1844_v52, 0.0  ;;  %v855_v40 = vpack.c.bf16 %v1844_v52, %v1844_v52  ;;  %v1846_v59 = vpop.eup %1845 }
 0xcb0   : > { %851 = vadd.xlane.f32.xlu2 %v850_v53  ;;  %v849_v61 = vmul.f32 %v2302_v39, %v1846_v59  ;;  %v854_v63 = vmul.f32 %v2298_v56, %v1846_v59  ;;  %v2751_v39 = vmov 0.0  }
 0xcb9   : > { %v860_v54 = vpop.permute.xlu1 %859 }
 0xcba   : > { %v865_v55 = vsel %vm523_vm8, %v860_v54, 0 }
 0xcbb   : > { %874 = vmatpush.bf16.msra.mxu1 %v865_v55 }
 0xcbe   : > { %1403 = vmatmul.msk.bf16.vlgmr.msra.gmra.mxu1 %vm502_vm7, %v855_v40 }
 0xd23   : > { %v852_v60 = vpop.xlane.xlu2 %851 }
 0xd24   : > { %v853_v62 = vadd.f32 %v852_v60, %v849_v61 }
 0xd26   : > { %1847 = vrcp.f32 %v853_v62 }
 0xd2c   : > { %v1848_v2 = vpop.eup %1847 }
 0xd3b   : > { %v876_v0 = vpop.f32.mrf.mxu1 }
 0xd3c   : > { %v880_v1 = vadd.f32 %v876_v0, %v854_v63 }
 0xd3e   : > { %v882_v3 = vmul.f32 %v1848_v2, %v880_v1 }
 0xd40   : > { %v883_v4 = vpack.c.bf16 %v882_v3, %v882_v3 }
 0xd42   : > { %885 = vrot.lane.b32.xlu2 %v883_v4, %s2350_s6 }
 0xd43   : > { %v878_v5 = vpop.f32.mrf.mxu1 }
 0xd99   : > { %1254 = sbr.rel (%p1378_p1) target bundleno = 4024 (0xfb8), region = 163 }
 0xd9c   : > { %v886_v57 = vpop.permute.xlu2 %885 }
 0xd9d   : > { %889 = vst.msk [vmem:[#allocation5] sm:$0xf] %vm888_vm11, %v886_v57 }
 0xd9e   : > { %v2757_v56 = vmov 0.0   ;;  %v2759_v9 = vmov 0.0   ;;  %v2761_v10 = vmov -inf  }
 0xd9f LB: >> { %s1405_s26 = sshll.u32 %s2322_s1, 3  ;;  %s2351_s8 = smov 80   ;;  %v910_v14 = vunpack.c.l.b16 %v2747_v6  ;;  %s2322_s1 = sphi %s2763_s1, %s894_s1   ;;  %v2318_v10 = vphi %v2761_v10, %v2917_v10   ;;  %v2314_v9 = vphi %v2759_v9, %v2916_v9   ;;  %v2310_v56 = vphi %v2757_v56, %v2915_v56  }
 0xda0   : >> { %s901_s10 = sshra.s32 %s1405_s26, 3  ;;  %s894_s1 = sadd.s32 1, %s2322_s1  }
 0xda1   : >> { %s1406_s12 = sshll.u32 %s901_s10, 2  ;;  %v911_v15 = vpack.c.b16 %v910_v14, %v910_v14  ;;  %p893_p3 = scmp.ge.s32.totalorder %s894_s1, %s2206_s21 }
 0xda2   : >> { %s904_s18 = scalar_lea.vmem [#allocation3], %s1406_s12  ;;  %s907_s14 = scalar_lea.vmem [#allocation4], %s1406_s12 }
 0xda3   : >> { %v905_v11 = vld [vmem:[%s904_s18] sm:$0xf] }
 0xda4   : >> { %v915_v12 = vunpack.c.l.b16 %v905_v11  ;;  %v908_v22 = vld [vmem:[%s907_s14] sm:$0xf] }
 0xda5   : >> { %v956_v23 = vunpack.c.l.b16 %v908_v22 }
 0xda6   : >> { %v916_v13 = vpack.c.b16 %v915_v12, %v915_v12 }
 0xda7   : >> { %v957_v24 = vpack.c.b16 %v956_v23, %v956_v23 }
 0xda8   : >> { %917 = vrot.lane.b32.xlu0 %v916_v13, %s2351_s8 }
 0xdb0   : >> { %912 = vrot.lane.b32.xlu0 %v911_v15, %s2351_s8 }
 0xe1a   : >> { %v918_v16 = vpop.permute.xlu0 %917 }
 0xe1b   : >> { %v923_v17 = vsel %vm482_vm6, %v918_v16, 0 }
 0xe1c   : >> { %932 = vmatpush.bf16.xpose.msra.mxu0 %v923_v17 }
 0xe22   : >> { %v913_v18 = vpop.permute.xlu0 %912 }
 0xe23   : >> { %1408 = vmatmul.msk.bf16.vlgmr.msra.gmra.mxu0 %vm482_vm6, %v913_v18 }
 0xea0   : >> { %v934_v19 = vpop.f32.mrf.mxu0 }
 0xea1   : >> { %v938_v20 = vsel %vm502_vm7, %v934_v19, -inf }
 0xea2   : >> { %939 = vmax.xlane.f32.xlu1 %v938_v20 }
 0xea8   : >> { %v936_v21 = vpop.f32.mrf.mxu0 }
 0xebb   : >> { %958 = vrot.lane.b32.xlu1 %v957_v24, %s2351_s8 }
 0xf15   : >> { %v940_v26 = vpop.xlane.xlu1 %939 }
 0xf16   : >> { %v941_v27 = vmax.f32 %v2318_v10, %v940_v26  }
 0xf18   : >> { %v942_v28 = vsub.f32 %v2318_v10, %v941_v27  ;;  %v945_v29 = vsub.f32 %v934_v19, %v941_v27  ;;  %v2917_v10 = vmov %v941_v27  ;;  %v2920_v8 = vmov (%p893_p3), %v941_v27 }
 0xf1a   : >> { %v946_v25 = vmul.f32 1.442695, %v945_v29  ;;  %v943_v35 = vmul.f32 1.442695, %v942_v28 }
 0xf1c   : >> { %1849 = vpow2.f32 %v946_v25 }
 0xf1d   : >> { %1851 = vpow2.f32 %v943_v35 }
 0xf22   : >> { %v1850_v30 = vpop.eup %1849 }
 0xf23   : >> { %v949_v31 = vsel %vm502_vm7, %v1850_v30, 0.0  ;;  %v954_v34 = vpack.c.bf16 %v1850_v30, %v1850_v30  ;;  %v1852_v36 = vpop.eup %1851 }
 0xf24   : >> { %950 = vadd.xlane.f32.xlu2 %v949_v31  ;;  %v948_v37 = vmul.f32 %v2314_v9, %v1852_v36  ;;  %v953_v44 = vmul.f32 %v2310_v56, %v1852_v36 }
 0xf2d   : >> { %v959_v32 = vpop.permute.xlu1 %958 }
 0xf2e   : >> { %v964_v33 = vsel %vm523_vm8, %v959_v32, 0 }
 0xf2f   : >> { %973 = vmatpush.bf16.msra.mxu1 %v964_v33 }
 0xf32   : >> { %1409 = vmatmul.msk.bf16.vlgmr.msra.gmra.mxu1 %vm502_vm7, %v954_v34 }
 0xf97   : >> { %v951_v41 = vpop.xlane.xlu2 %950 }
 0xf98   : >> { %v952_v43 = vadd.f32 %v951_v41, %v948_v37  }
 0xf9a   : >> { %v2916_v9 = vmov %v952_v43  ;;  %v2919_v39 = vmov (%p893_p3), %v952_v43 }
 0xfaf   : >> { %v975_v45 = vpop.f32.mrf.mxu1 }
 0xfb0   : >> { %v979_v46 = vadd.f32 %v975_v45, %v953_v44  }
 0xfb2   : >> { %v2915_v56 = vmov %v979_v46  ;;  %v2918_v7 = vmov (%p893_p3), %v979_v46 }
 0xfb3   : > { %896 = sbr.rel (!%p893_p3) target bundleno = 3487 (0xd9f), region = 169 }
 0xfb7   : >> { %v977_v47 = vpop.f32.mrf.mxu1 }
 0xfb8 PF: > { %v980_v48 = vld [vmem:[%s2607_s13] sm:$0xf]  ;;  %s2352_s9 = smov 80   ;;  %v983_v51 = vunpack.c.l.b16 %v2747_v6  ;;  %v1446_v56 = vld [vmem:[#allocation11 + $0x18] sm:$0xff]  ;;  %v1445_v10 = vld [vmem:[#allocation11 + $0x10] sm:$0xff]  ;;  %s2353_s13 = smov 48   ;;  %v2334_v8 = vphi %v2753_v8, %v2920_v8   ;;  %v2330_v39 = vphi %v2751_v39, %v2919_v39   ;;  %v2326_v7 = vphi %v2749_v7, %v2918_v7  }
 0xfb9   : > { %v988_v49 = vunpack.c.l.b16 %v980_v48  ;;  %v981_v60 = vld [vmem:[%s2616_s3] sm:$0xf]  ;;  %1107 = vmatpush.bf16.msra.mxu2 %v1446_v56  ;;  %v1444_v21 = vld [vmem:[#allocation11 + $0x8] sm:$0xff]  ;;  %vm1060_vm12 = vcmask 519552   ;;  %vm1099_vm13 = vcmask 523264   ;;  %s1430_s3 = sshll.u32 %s2210_s22, 1 }
 0xfba   : > { %v984_v52 = vpack.c.b16 %v983_v51, %v983_v51  ;;  %v1029_v61 = vunpack.c.l.b16 %v981_v60  ;;  %v1443_v22 = vld [vmem:[#allocation11] sm:$0xff]  ;;  %s1128_s2 = sadd.s32 %s2206_s21, %s1430_s3  ;;  %s2921_s28 = sld [smem:[#allocation27_spill]] }
 0xfbb   : > { %v989_v50 = vpack.c.b16 %v988_v49, %v988_v49  ;;  %s1431_s7 = sshll.u32 %s1128_s2, 3  ;;  %v1853_v23 = vld [vmem:[#allocation12] ss:$0 sm:$0xff]  ;;  %s1132_s1 = sshll.u32 %s279_s29, 4  ;;  %s1133_s1 = int_to_ptr.vmem [resolvable:$true] %s1132_s1 }
 0xfbc   : > { %v1030_v62 = vpack.c.b16 %v1029_v61, %v1029_v61  ;;  %s1118_s10 = scalar_lea.sflag [#allocation8], %s277_s4 }
 0xfbd   : > { %990 = vrot.lane.b32.xlu0 %v989_v50, %s2352_s9  ;;  %1108 = vmatpush.bf16.msra.mxu2 %v1445_v10 }
 0xfc0   : > { %s1130_s6 = scalar_lea.hbm %s2921_s28, %s1431_s7  ;;  %s2000_s8 = scalar_lea.hbm %s2921_s28, 32 }
 0xfc1   : > { %1109 = vmatpush.bf16.msra.mxu2 %v1444_v21  ;;  %s1134_s26 = sshll.u32 %s1130_s6, 4  ;;  %s1135_s26 = int_to_ptr.hbm [resolvable:$true] %s1134_s26 }
 0xfc2   : > { %s1994_s22 = sshra.s32 %s1135_s26, 4  ;;  %s1995_s22 = int_to_ptr.hbm [resolvable:$true] %s1994_s22 }
 0xfc3   : > { %s1996_s21 = scalar_lea.hbm %s1995_s22, 8  ;;  %p2001_p9 = scmp.lt.s32.totalorder %s1995_s22, %s2921_s28 }
 0xfc4   : > { %p1997_p5 = scmp.ne.s32.totalorder %s1995_s22, %s1996_s21  ;;  %p2002_p12 = scmp.lt.s32.totalorder %s2000_s8, %s1996_s21 }
 0xfc5   : > { %985 = vrot.lane.b32.xlu0 %v984_v52, %s2352_s9  ;;  %1110 = vmatpush.bf16.msra.mxu2 %v1443_v22 }
 0xfc6   : > { %p1998_p7 = pnand %p1997_p5, %p2449_p6  ;;  %p2003_p13 = por %p2002_p12, %p2001_p9 }
 0xfc8   : > { %p1999_p8 = pneg %p1998_p7 }
 0xfca   : > { %p2004_p4 = pnand %p2003_p13, %p1999_p8 }
0x102f   : > { %v991_v53 = vpop.permute.xlu0 %990 }
0x1030   : > { %v996_v54 = vsel %vm482_vm6, %v991_v53, 0 }
0x1031   : > { %1005 = vmatpush.bf16.xpose.msra.mxu0 %v996_v54 }
0x1037   : > { %v986_v55 = vpop.permute.xlu0 %985 }
0x1038   : > { %1410 = vmatmul.msk.bf16.vlgmr.msra.gmra.mxu0 %vm482_vm6, %v986_v55 }
0x10b5   : > { %v1007_v40 = vpop.f32.mrf.mxu0 }
0x10b6   : > { %v1008_v38 = vadd.f32 %v1007_v40, %v2572_v42 }
0x10b8   : > { %v1011_v58 = vsel %vm502_vm7, %v1008_v38, -inf }
0x10b9   : > { %1012 = vmax.xlane.f32.xlu1 %v1011_v58 }
0x10bd   : > { %v1009_v59 = vpop.f32.mrf.mxu0 }
0x10d2   : > { %1031 = vrot.lane.b32.xlu1 %v1030_v62, %s2352_s9 }
0x112c   : > { %v1013_v63 = vpop.xlane.xlu1 %1012 }
0x112d   : > { %v1014_v0 = vmax.f32 %v2334_v8, %v1013_v63 }
0x112f   : > { %v1018_v1 = vsub.f32 %v1008_v38, %v1014_v0  ;;  %v1015_v57 = vsub.f32 %v2334_v8, %v1014_v0 }
0x1131   : > { %v1019_v2 = vmul.f32 1.442695, %v1018_v1  ;;  %v1016_v9 = vmul.f32 1.442695, %v1015_v57 }
0x1133   : > { %1854 = vpow2.f32 %v1019_v2 }
0x1134   : > { %1856 = vpow2.f32 %v1016_v9 }
0x1139   : > { %v1855_v3 = vpop.eup %1854 }
0x113a   : > { %v1022_v4 = vsel %vm502_vm7, %v1855_v3, 0.0  ;;  %v1027_v6 = vpack.c.bf16 %v1855_v3, %v1855_v3  ;;  %v1857_v11 = vpop.eup %1856 }
0x113b   : > { %1023 = vadd.xlane.f32.xlu2 %v1022_v4  ;;  %v1021_v13 = vmul.f32 %v2330_v39, %v1857_v11  ;;  %v1026_v15 = vmul.f32 %v2326_v7, %v1857_v11 }
0x1144   : > { %v1032_v5 = vpop.permute.xlu1 %1031 }
0x1145   : > { %v1037_v42 = vsel %vm523_vm8, %v1032_v5, 0 }
0x1146   : > { %1046 = vmatpush.bf16.msra.mxu1 %v1037_v42 }
0x1149   : > { %1411 = vmatmul.msk.bf16.vlgmr.msra.gmra.mxu1 %vm502_vm7, %v1027_v6 }
0x11ae   : > { %v1024_v12 = vpop.xlane.xlu2 %1023 }
0x11af   : > { %v1025_v14 = vadd.f32 %v1024_v12, %v1021_v13 }
0x11b1   : > { %1858 = vrcp.f32 %v1025_v14 }
0x11b7   : > { %v1859_v18 = vpop.eup %1858 }
0x11c6   : > { %v1048_v16 = vpop.f32.mrf.mxu1 }
0x11c7   : > { %v1052_v17 = vadd.f32 %v1048_v16, %v1026_v15 }
0x11c9   : > { %v1054_v19 = vmul.f32 %v1859_v18, %v1052_v17 }
0x11cb   : > { %v1055_v20 = vpack.c.bf16 %v1054_v19, %v1054_v19 }
0x11cd   : > { %1057 = vrot.lane.b32.xlu2 %v1055_v20, %s2353_s13 }
0x11ce   : > { %v1050_v8 = vpop.f32.mrf.mxu1 }
0x1227   : > { %v1058_v39 = vpop.permute.xlu2 %1057 }
0x1228   : > { %1061 = vst.msk [vmem:[#allocation5] sm:$0xf] %vm1060_vm12, %v1058_v39 }
0x122f   : > { %v1062_v7 = vld [vmem:[#allocation5] sm:$0xf] }
0x1230   : > { %1428 = vmatmul.msk.bf16.vlgmr.msra.gmra.mxu2 %vm1099_vm13, %v1062_v7 }
0x12b3   : > { %v1112_v24 = vpop.f32.mrf.mxu2 }
0x12b4   : > { %v1113_v26 = vadd.f32 %v1853_v23, %v1112_v24 }
0x12b6   : > { %1116 = vst.msk [vmem:[%s279_s29] sm:$0xff] %vm1099_vm13, %v1113_v26 }
0x12b7   : > { %2007 = shalt.err (!%p2004_p4)
}
0x12b8   : > { %1461 = dma.vmem_to_hbm [thread:$0]  (%p2449_p6), %s1133_s1, 128, %s1135_s26, %s1118_s10  }
0x12bb   : > { %v1114_v27 = vpop.f32.mrf.mxu2 }
0x12bc PF: > { %s2922_s4 = sld [smem:[#allocation19_spill]]  ;;  %p1488_p1 = scmp.ge.s32.totalorder %s2222_s25, 2 }
0x12be   : > { %p1478_p11 = pnand %p1488_p1, %p2455_p10 }
0x12c0   : > { %p1479_p0 = pneg %p1478_p11 }
0x12c2   : > { %s1146_s29 = sand.u32 1, %s2922_s4  }
0x12c3   : > { %s1147_s13 = scalar_lea.sflag [#allocation8], %s1146_s29 }
0x12c4   : > { %2177 = dma.done.wait (%p1479_p0), %s1147_s13, 128  }
0x12c5   : > { %2179 = vsyncadd (%p1479_p0), %s1147_s13, 4294967168  ;;  %s22_s25 = sadd.s32 1, %s2222_s25   ;;  %s2924_s21 = sld [smem:[#allocation20_spill]] }
0x12c6   : > { %p19_p2 = scmp.ge.s32.totalorder %s22_s25, 6   ;;  %s2925_s23 = sld [smem:[#allocation22_spill]] }
0x12c7   : > { %s2926_s30 = sld [smem:[#allocation23_spill]]  ;;  %s2927_s15 = smov %s2186_s16 }
0x12c8   : > { %s2928_s16 = smov %s2190_s17  ;;  %s2929_s17 = smov %s2516_s27 }
0x12c9   : > { %s2930_s18 = smov %s2198_s19  ;;  %s2931_s19 = smov %s2202_s20 }
0x12ca   : > { %s2932_s20 = smov %s2513_s11  ;;  %s2933_s22 = smov %s2218_s24 }
0x12cb   :  { %21 = sbr.rel (!%p19_p2) target bundleno = 16 (0x10), region = 180 }
0x12cd   : > { %s2934_s24 = smov %s2926_s30 }
0x12d0   :  { %1153 = vsyncpa [#allocation7], 1 }
0x12d1   :  { %1155 = vsyncpa [#allocation7 + $0x1], 1 }
0x12d2   :  { %1156 = vsyncpa [#allocation10], 1 }
0x12d3   :  { %1157 = vsyncpa [#allocation13], 1 }
0x12d4   :  { %1158 = vsyncpa [#allocation8], 1 }
0x12d5   :  { %1160 = vsyncpa [#allocation8 + $0x1], 1 }

</bundles_post_ra>
